<compile_context>
chip_gen: v7x
topology: tpu7x:2x2x1
jax: 0.10.0
libtpu: 0.0.40
codegen_flags: <defaults>
</compile_context>

<pallas_src>
import math

import jax
import jax.numpy as jnp
import numpy as np
from jax.experimental import pallas as pl
from jax.experimental.pallas import tpu as pltpu

# ---- small GPT config consistent with the module ----
VOCAB_SIZE = 65
VOCAB_PAD = 128           # pad head output to a full 128-lane slab
BLOCK_SIZE = 16           # model context size
N_EMBD = 32
N_HEAD = 4
N_LAYER = 2
HEAD_DIM = N_EMBD // N_HEAD
LN_EPS = 1e-5
QKV_PAD = 128             # 3*N_EMBD = 96 padded to a full lane slab
BIAS_ROWS_PER_LAYER = 8   # ln1w, ln1b, bqkv, bp, ln2w, ln2b, b1, b2
NEG_INF = -1e9            # large finite negative additive mask (no NaN risk)


# --------------------------- math helpers ------------------------------------
def _layernorm(x, w, b):
    mu = jnp.mean(x, axis=-1, keepdims=True)
    var = jnp.mean((x - mu) ** 2, axis=-1, keepdims=True)
    return (x - mu) * jax.lax.rsqrt(var + LN_EPS) * w + b


def _gelu_tanh(x):
    # tanh-approximate GELU; tanh runs on the EUP slot so the (T,128) MLP hidden
    # costs almost no VALU work.  Deviation from exact-erf GELU at the ~0.1-scale
    # activations here is << the 5e-3 check tolerance.
    c = 0.7978845608028654  # sqrt(2/pi)
    return 0.5 * x * (1.0 + jnp.tanh(c * (x + 0.044715 * x * x * x)))


def _gelu_exact(x):
    # exact erf GELU (torch.nn.GELU default) -- used by the pure-JAX reference.
    return 0.5 * x * (1.0 + jax.lax.erf(x * (1.0 / math.sqrt(2.0))))


# --------------------------- fused Pallas kernel -----------------------------
def _make_gpt_kernel(T):
    """Whole GPT forward for one batch element (T rows) per grid program.

    ref order: idx(T,1), tok_emb(VOCAB_PAD,C), pos(T,C),
               wqkv(L,C,128), wproj(L,C,C), w1(L,C,4C), w2(L,4C,C),
               bias_slab(L*8+2,128), head(C,VOCAB_PAD), out(T,VOCAB_PAD)
    """
    scale = 1.0 / math.sqrt(HEAD_DIM)

    def kernel(idx_ref, tok_ref, pos_ref, wqkv_ref, wp_ref, w1_ref, w2_ref,
               bias_ref, head_ref, o_ref):
        # ---- token embedding as a one-hot matmul (MXU) + position embedding
        lane = jax.lax.broadcasted_iota(jnp.int32, (T, VOCAB_PAD), 1)
        onehot = (lane == idx_ref[...]).astype(jnp.float32)            # (T, VPAD)
        x = jnp.dot(onehot, tok_ref[...],
                    preferred_element_type=jnp.float32) + pos_ref[...]  # (T, C)

        # ---- causal additive mask (T, T), computed once per program
        r = jax.lax.broadcasted_iota(jnp.int32, (T, T), 0)
        c = jax.lax.broadcasted_iota(jnp.int32, (T, T), 1)
        mask_add = jnp.where(c <= r, 0.0, NEG_INF).astype(jnp.float32)

        def brow(i, width=N_EMBD):          # one packed bias/LN row (1, width)
            return bias_ref[i:i + 1, :width]

        # ---- statically unrolled transformer blocks
        for l in range(N_LAYER):
            base = l * BIAS_ROWS_PER_LAYER

            # --- causal multi-head self-attention on ln1(x) ---
            hln = _layernorm(x, brow(base + 0), brow(base + 1))        # (T, C)
            qkv = jnp.dot(hln, wqkv_ref[l],                            # (T, 128)
                          preferred_element_type=jnp.float32) + brow(base + 2, QKV_PAD)
            heads = []
            for h in range(N_HEAD):                                    # static unroll
                q = qkv[:, h * HEAD_DIM:(h + 1) * HEAD_DIM]            # (T, D)
                k = qkv[:, N_EMBD + h * HEAD_DIM:N_EMBD + (h + 1) * HEAD_DIM]
                v = qkv[:, 2 * N_EMBD + h * HEAD_DIM:2 * N_EMBD + (h + 1) * HEAD_DIM]
                att = jnp.dot(q, k.T,
                              preferred_element_type=jnp.float32) * scale + mask_add
                att = jnp.exp(att - jnp.max(att, axis=-1, keepdims=True))
                att = att * pl.reciprocal(
                    jnp.sum(att, axis=-1, keepdims=True), approx=True)
                heads.append(jnp.dot(att, v, preferred_element_type=jnp.float32))
            y = jnp.concatenate(heads, axis=-1)                        # (T, C)
            x = x + jnp.dot(y, wp_ref[l],
                            preferred_element_type=jnp.float32) + brow(base + 3)

            # --- MLP on ln2(x): Linear -> GELU -> Linear ---
            h2 = _layernorm(x, brow(base + 4), brow(base + 5))
            m = jnp.dot(h2, w1_ref[l],
                        preferred_element_type=jnp.float32) + brow(base + 6, 4 * N_EMBD)
            m = _gelu_tanh(m)
            x = x + jnp.dot(m, w2_ref[l],
                            preferred_element_type=jnp.float32) + brow(base + 7)

        # ---- final LayerNorm + head (no bias), lane-dense padded output
        gbase = N_LAYER * BIAS_ROWS_PER_LAYER
        xf = _layernorm(x, brow(gbase + 0), brow(gbase + 1))
        o_ref[...] = jnp.dot(xf, head_ref[...], preferred_element_type=jnp.float32)

    return kernel


# --------------------------- wrapper ------------------------------------------
def gpt_forward(idx, params):
    B, T = idx.shape
    assert T <= BLOCK_SIZE, "Cannot forward, model block size is exhausted."
    assert T % 8 == 0, "per-batch grid blocks need T to be a sublane multiple"
    BT = B * T

    idx_flat = idx.reshape(BT, 1).astype(jnp.int32)
    tok_pad = jnp.zeros((VOCAB_PAD, N_EMBD), jnp.float32).at[:VOCAB_SIZE].set(
        params["tok_emb"])
    pos = params["pos_emb"][0, :T, :]                                   # (T, C)
    head_pad = jnp.zeros((N_EMBD, VOCAB_PAD), jnp.float32).at[:, :VOCAB_SIZE].set(
        params["head_w"])

    def _row(vec):
        vec = vec.reshape(-1)
        return jnp.zeros((1, QKV_PAD), jnp.float32).at[0, :vec.shape[0]].set(vec)

    wqkv_l, wp_l, w1_l, w2_l, bias_rows = [], [], [], [], []
    for (ln1w, ln1b, wq, bq, wk, bk, wv, bv, wp, bp,
         ln2w, ln2b, w1, b1, w2, b2) in params["layers"]:
        wqkv = jnp.concatenate([wq, wk, wv], axis=1)                    # (C, 3C)
        wqkv_l.append(jnp.zeros((N_EMBD, QKV_PAD), jnp.float32)
                      .at[:, :3 * N_EMBD].set(wqkv))
        wp_l.append(wp)
        w1_l.append(w1)
        w2_l.append(w2)
        bias_rows += [_row(ln1w), _row(ln1b),
                      _row(jnp.concatenate([bq, bk, bv], axis=1)),
                      _row(bp), _row(ln2w), _row(ln2b), _row(b1), _row(b2)]
    bias_rows += [_row(params["lnf_w"]), _row(params["lnf_b"])]

    wqkv_all = jnp.stack(wqkv_l)                 # (L, C, 128)
    wp_all = jnp.stack(wp_l)                     # (L, C, C)
    w1_all = jnp.stack(w1_l)                     # (L, C, 4C)
    w2_all = jnp.stack(w2_l)                     # (L, 4C, C)
    bias_slab = jnp.concatenate(bias_rows, axis=0)   # (L*8+2, 128)

    def full(shape):                             # whole-array VMEM-resident block
        return pl.BlockSpec(shape, lambda b, _s=shape: (0,) * len(_s))

    out = pl.pallas_call(
        _make_gpt_kernel(T),
        out_shape=jax.ShapeDtypeStruct((BT, VOCAB_PAD), jnp.float32),
        grid=(B,),
        in_specs=[
            pl.BlockSpec((T, 1), lambda b: (b, 0)),                 # idx rows of batch b
            full((VOCAB_PAD, N_EMBD)),                              # token embedding (padded)
            full((T, N_EMBD)),                                      # positional embedding
            full((N_LAYER, N_EMBD, QKV_PAD)),                       # fused qkv weights
            full((N_LAYER, N_EMBD, N_EMBD)),                        # attn out-proj weights
            full((N_LAYER, N_EMBD, 4 * N_EMBD)),                    # mlp fc1 weights
            full((N_LAYER, 4 * N_EMBD, N_EMBD)),                    # mlp fc2 weights
            full((N_LAYER * BIAS_ROWS_PER_LAYER + 2, QKV_PAD)),     # packed LN/bias slab
            full((N_EMBD, VOCAB_PAD)),                              # lm head (padded)
        ],
        out_specs=pl.BlockSpec((T, VOCAB_PAD), lambda b: (b, 0)),
        compiler_params=pltpu.CompilerParams(
            dimension_semantics=("parallel",)),                     # v7x: shard batch on 2 TCs
    )(idx_flat, tok_pad, pos, wqkv_all, wp_all, w1_all, w2_all, bias_slab, head_pad)

    # drop the vocab padding and restore (B, T, V)
    return out[:, :VOCAB_SIZE].reshape(B, T, VOCAB_SIZE)
    # TODO(synk): targets / cross-entropy loss and the tNet(points) branch are
    # not exercised here (defaults targets=None, points=None, pointNetConfig=None).


# --------------------------- pure-JAX reference ------------------------------
def ref_forward(idx, p):
    P = jax.lax.Precision.HIGHEST
    tok = p["tok_emb"][idx]
    B, T, C = tok.shape
    x = tok + p["pos_emb"][:, :T, :]
    mask = jnp.tril(jnp.ones((T, T), bool))
    for (ln1w, ln1b, wq, bq, wk, bk, wv, bv, wp, bp,
         ln2w, ln2b, w1, b1, w2, b2) in p["layers"]:
        h = _layernorm(x, ln1w, ln1b)
        q = jnp.einsum("btc,cd->btd", h, wq, precision=P) + bq
        k = jnp.einsum("btc,cd->btd", h, wk, precision=P) + bk
        v = jnp.einsum("btc,cd->btd", h, wv, precision=P) + bv
        q = q.reshape(B, T, N_HEAD, HEAD_DIM).transpose(0, 2, 1, 3)
        k = k.reshape(B, T, N_HEAD, HEAD_DIM).transpose(0, 2, 1, 3)
        v = v.reshape(B, T, N_HEAD, HEAD_DIM).transpose(0, 2, 1, 3)
        att = jnp.einsum("bhtd,bhsd->bhts", q, k, precision=P) / math.sqrt(HEAD_DIM)
        att = jnp.where(mask, att, -jnp.inf)
        att = jax.nn.softmax(att, axis=-1)
        y = jnp.einsum("bhts,bhsd->bhtd", att, v, precision=P)
        y = y.transpose(0, 2, 1, 3).reshape(B, T, C)
        y = jnp.einsum("btc,cd->btd", y, wp, precision=P) + bp
        x = x + y
        h2 = _layernorm(x, ln2w, ln2b)
        m = jnp.einsum("btc,cd->btd", h2, w1, precision=P) + b1
        m = _gelu_exact(m)
        m = jnp.einsum("btd,dc->btc", m, w2, precision=P) + b2
        x = x + m
    x = _layernorm(x, p["lnf_w"], p["lnf_b"])
    return jnp.einsum("btc,cv->btv", x, p["head_w"], precision=P)


# --------------------------- deterministic init ------------------------------
def init_params(key):
    keys = iter(jax.random.split(key, 8 + 8 * N_LAYER))

    def nrm(shape):  # matches module._init_weights: normal(0, 0.02)
        return (0.02 * jax.random.normal(next(keys), shape)).astype(jnp.float32)

    ones = lambda s: jnp.ones(s, jnp.float32)
    zeros = lambda s: jnp.zeros(s, jnp.float32)

    layers = []
    for _ in range(N_LAYER):
        layers.append((
            ones((1, N_EMBD)), zeros((1, N_EMBD)),                  # ln1 w,b
            nrm((N_EMBD, N_EMBD)), zeros((1, N_EMBD)),              # query
            nrm((N_EMBD, N_EMBD)), zeros((1, N_EMBD)),              # key
            nrm((N_EMBD, N_EMBD)), zeros((1, N_EMBD)),              # value
            nrm((N_EMBD, N_EMBD)), zeros((1, N_EMBD)),              # proj
            ones((1, N_EMBD)), zeros((1, N_EMBD)),                  # ln2 w,b
            nrm((N_EMBD, 4 * N_EMBD)), zeros((1, 4 * N_EMBD)),      # mlp fc1
            nrm((4 * N_EMBD, N_EMBD)), zeros((1, N_EMBD)),          # mlp fc2
        ))
    return {
        "tok_emb": nrm((VOCAB_SIZE, N_EMBD)),
        "pos_emb": zeros((1, BLOCK_SIZE, N_EMBD)),   # torch.zeros init, untouched
        "layers": layers,
        "lnf_w": ones((1, N_EMBD)),
        "lnf_b": zeros((1, N_EMBD)),
        "head_w": nrm((N_EMBD, VOCAB_SIZE)),          # head has bias=False
    }


# --------------------------- main --------------------------------------------
if __name__ == "__main__":
    key = jax.random.PRNGKey(0)
    kparam, kidx = jax.random.split(key)
    params = init_params(kparam)

    B, T = 2, 8
    assert T <= BLOCK_SIZE
    idx = jax.random.randint(kidx, (B, T), 0, VOCAB_SIZE, dtype=jnp.int32)

    fwd = jax.jit(gpt_forward)
    logits = fwd(idx, params)                  # (B, T, VOCAB_SIZE)
    logits = jax.block_until_ready(logits)

    ref = ref_forward(idx, params)
    np.testing.assert_allclose(np.asarray(logits), np.asarray(ref),
                               rtol=5e-3, atol=5e-3)
    print("KERNEL_OK")
</pallas_src>

<mosaic_0001>
module attributes {stable_mosaic.version = 11 : i64} {
  func.func @kernel(%arg0: i32, %arg1: memref<8x1xi32, #tpu.memory_space<vmem>>, %arg2: memref<128x32xf32, #tpu.memory_space<vmem>>, %arg3: memref<8x32xf32, #tpu.memory_space<vmem>>, %arg4: memref<2x32x128xf32, #tpu.memory_space<vmem>>, %arg5: memref<2x32x32xf32, #tpu.memory_space<vmem>>, %arg6: memref<2x32x128xf32, #tpu.memory_space<vmem>>, %arg7: memref<2x128x32xf32, #tpu.memory_space<vmem>>, %arg8: memref<18x128xf32, #tpu.memory_space<vmem>>, %arg9: memref<32x128xf32, #tpu.memory_space<vmem>>, %arg10: memref<8x128xf32, #tpu.memory_space<vmem>>) attributes {dimension_semantics = [#tpu.dimension_semantics<parallel>], iteration_bounds = array<i64: 2>, scalar_prefetch = 0 : i64, scratch_operands = 0 : i64, tpu.core_type = #tpu.core_type<tc>, window_params = [{transform_indices = @transform_0, window_bounds = array<i64: 8, 1>}, {pipeline_mode = #tpu.pipeline_mode<synchronous>, transform_indices = @transform_1, window_bounds = array<i64: 128, 32>}, {pipeline_mode = #tpu.pipeline_mode<synchronous>, transform_indices = @transform_2, window_bounds = array<i64: 8, 32>}, {pipeline_mode = #tpu.pipeline_mode<synchronous>, transform_indices = @transform_3, window_bounds = array<i64: 2, 32, 128>}, {pipeline_mode = #tpu.pipeline_mode<synchronous>, transform_indices = @transform_4, window_bounds = array<i64: 2, 32, 32>}, {pipeline_mode = #tpu.pipeline_mode<synchronous>, transform_indices = @transform_5, window_bounds = array<i64: 2, 32, 128>}, {pipeline_mode = #tpu.pipeline_mode<synchronous>, transform_indices = @transform_6, window_bounds = array<i64: 2, 128, 32>}, {pipeline_mode = #tpu.pipeline_mode<synchronous>, transform_indices = @transform_7, window_bounds = array<i64: 18, 128>}, {pipeline_mode = #tpu.pipeline_mode<synchronous>, transform_indices = @transform_8, window_bounds = array<i64: 32, 128>}, {transform_indices = @transform_9, window_bounds = array<i64: 8, 128>}]} {
    %0 = tpu.iota {dimensions = array<i32: 1>} : vector<8x128xi32>
    %c0 = arith.constant 0 : index
    %c0_0 = arith.constant 0 : index
    %1 = vector.load %arg1[%c0, %c0_0] : memref<8x1xi32, #tpu.memory_space<vmem>>, vector<8x1xi32>
    %2 = vector.broadcast %1 : vector<8x1xi32> to vector<8x128xi32>
    %3 = arith.cmpi eq, %0, %2 : vector<8x128xi32>
    %4 = arith.extui %3 : vector<8x128xi1> to vector<8x128xi32>
    %5 = arith.sitofp %4 : vector<8x128xi32> to vector<8x128xf32>
    %c0_1 = arith.constant 0 : index
    %c0_2 = arith.constant 0 : index
    %6 = vector.load %arg2[%c0_1, %c0_2] : memref<128x32xf32, #tpu.memory_space<vmem>>, vector<128x32xf32>
    %cst = arith.constant dense<0.000000e+00> : vector<8x32xf32>
    %7 = tpu.matmul %5, %6, %cst {dimension_numbers = #tpu.dot_dimension_numbers<[1], [0], [0], [1], [0, 0, 1, 1], [], []>} : vector<8x128xf32>, vector<128x32xf32>, vector<8x32xf32> -> vector<8x32xf32>
    %c0_3 = arith.constant 0 : index
    %c0_4 = arith.constant 0 : index
    %8 = vector.load %arg3[%c0_3, %c0_4] : memref<8x32xf32, #tpu.memory_space<vmem>>, vector<8x32xf32>
    %9 = arith.addf %7, %8 : vector<8x32xf32>
    %10 = tpu.iota {dimensions = array<i32: 0>} : vector<8x8xi32>
    %11 = tpu.iota {dimensions = array<i32: 1>} : vector<8x8xi32>
    %12 = arith.cmpi sle, %11, %10 : vector<8x8xi32>
    %cst_5 = arith.constant 0.000000e+00 : f32
    %cst_6 = arith.constant -1.000000e+09 : f32
    %13 = vector.broadcast %cst_5 : f32 to vector<8x8xf32>
    %14 = vector.broadcast %cst_6 : f32 to vector<8x8xf32>
    %15 = arith.select %12, %13, %14 : vector<8x8xi1>, vector<8x8xf32>
    %c0_7 = arith.constant 0 : index
    %c0_8 = arith.constant 0 : index
    %16 = vector.load %arg8[%c0_7, %c0_8] : memref<18x128xf32, #tpu.memory_space<vmem>>, vector<1x32xf32>
    %c1 = arith.constant 1 : index
    %c0_9 = arith.constant 0 : index
    %17 = vector.load %arg8[%c1, %c0_9] : memref<18x128xf32, #tpu.memory_space<vmem>>, vector<1x32xf32>
    %cst_10 = arith.constant dense<0.000000e+00> : vector<8xf32>
    %18 = vector.multi_reduction <add>, %9, %cst_10 [1] : vector<8x32xf32> to vector<8xf32>
    %19 = vector.shape_cast %18 : vector<8xf32> to vector<8x1xf32>
    %cst_11 = arith.constant 3.200000e+01 : f32
    %20 = vector.broadcast %cst_11 : f32 to vector<8x1xf32>
    %21 = arith.divf %19, %20 : vector<8x1xf32>
    %22 = vector.broadcast %21 : vector<8x1xf32> to vector<8x32xf32>
    %23 = arith.subf %9, %22 : vector<8x32xf32>
    %24 = arith.mulf %23, %23 : vector<8x32xf32>
    %cst_12 = arith.constant dense<0.000000e+00> : vector<8xf32>
    %25 = vector.multi_reduction <add>, %24, %cst_12 [1] : vector<8x32xf32> to vector<8xf32>
    %26 = vector.shape_cast %25 : vector<8xf32> to vector<8x1xf32>
    %cst_13 = arith.constant 3.200000e+01 : f32
    %27 = vector.broadcast %cst_13 : f32 to vector<8x1xf32>
    %28 = arith.divf %26, %27 : vector<8x1xf32>
    %29 = vector.broadcast %21 : vector<8x1xf32> to vector<8x32xf32>
    %30 = arith.subf %9, %29 : vector<8x32xf32>
    %cst_14 = arith.constant 9.99999974E-6 : f32
    %31 = vector.broadcast %cst_14 : f32 to vector<8x1xf32>
    %32 = arith.addf %28, %31 : vector<8x1xf32>
    %33 = math.rsqrt %32 : vector<8x1xf32>
    %34 = vector.broadcast %33 : vector<8x1xf32> to vector<8x32xf32>
    %35 = arith.mulf %30, %34 : vector<8x32xf32>
    %36 = vector.broadcast %16 : vector<1x32xf32> to vector<8x32xf32>
    %37 = arith.mulf %35, %36 : vector<8x32xf32>
    %38 = vector.broadcast %17 : vector<1x32xf32> to vector<8x32xf32>
    %39 = arith.addf %37, %38 : vector<8x32xf32>
    %c0_15 = arith.constant 0 : index
    %c0_16 = arith.constant 0 : index
    %c0_17 = arith.constant 0 : index
    %40 = vector.load %arg4[%c0_15, %c0_16, %c0_17] : memref<2x32x128xf32, #tpu.memory_space<vmem>>, vector<1x32x128xf32>
    %41 = vector.shape_cast %40 : vector<1x32x128xf32> to vector<32x128xf32>
    %cst_18 = arith.constant dense<0.000000e+00> : vector<8x128xf32>
    %42 = tpu.matmul %39, %41, %cst_18 {dimension_numbers = #tpu.dot_dimension_numbers<[1], [0], [0], [1], [0, 0, 1, 1], [], []>} : vector<8x32xf32>, vector<32x128xf32>, vector<8x128xf32> -> vector<8x128xf32>
    %c2 = arith.constant 2 : index
    %c0_19 = arith.constant 0 : index
    %43 = vector.load %arg8[%c2, %c0_19] : memref<18x128xf32, #tpu.memory_space<vmem>>, vector<1x128xf32>
    %44 = vector.broadcast %43 : vector<1x128xf32> to vector<8x128xf32>
    %45 = arith.addf %42, %44 : vector<8x128xf32>
    %46 = vector.extract_strided_slice %45 {offsets = [0, 0], sizes = [8, 8], strides = [1, 1]} : vector<8x128xf32> to vector<8x8xf32>
    %47 = vector.extract_strided_slice %45 {offsets = [0, 32], sizes = [8, 8], strides = [1, 1]} : vector<8x128xf32> to vector<8x8xf32>
    %48 = vector.extract_strided_slice %45 {offsets = [0, 64], sizes = [8, 8], strides = [1, 1]} : vector<8x128xf32> to vector<8x8xf32>
    %49 = tpu.transpose %47, [1, 0] : vector<8x8xf32> -> vector<8x8xf32>
    %cst_20 = arith.constant dense<0.000000e+00> : vector<8x8xf32>
    %50 = tpu.matmul %46, %49, %cst_20 {dimension_numbers = #tpu.dot_dimension_numbers<[1], [0], [0], [1], [0, 0, 1, 1], [], []>} : vector<8x8xf32>, vector<8x8xf32>, vector<8x8xf32> -> vector<8x8xf32>
    %cst_21 = arith.constant 0.353553385 : f32
    %51 = vector.broadcast %cst_21 : f32 to vector<8x8xf32>
    %52 = arith.mulf %50, %51 : vector<8x8xf32>
    %53 = arith.addf %52, %15 : vector<8x8xf32>
    %cst_22 = arith.constant dense<0xFF800000> : vector<8xf32>
    %54 = vector.multi_reduction <maximumf>, %53, %cst_22 [1] : vector<8x8xf32> to vector<8xf32>
    %55 = vector.shape_cast %54 : vector<8xf32> to vector<8x1xf32>
    %56 = vector.broadcast %55 : vector<8x1xf32> to vector<8x8xf32>
    %57 = arith.subf %53, %56 : vector<8x8xf32>
    %58 = math.exp %57 : vector<8x8xf32>
    %cst_23 = arith.constant dense<0.000000e+00> : vector<8xf32>
    %59 = vector.multi_reduction <add>, %58, %cst_23 [1] : vector<8x8xf32> to vector<8xf32>
    %60 = vector.shape_cast %59 : vector<8xf32> to vector<8x1xf32>
    %61 = tpu.reciprocal %60 {approx = true} : vector<8x1xf32> -> vector<8x1xf32>
    %62 = vector.broadcast %61 : vector<8x1xf32> to vector<8x8xf32>
    %63 = arith.mulf %58, %62 : vector<8x8xf32>
    %cst_24 = arith.constant dense<0.000000e+00> : vector<8x8xf32>
    %64 = tpu.matmul %63, %48, %cst_24 {dimension_numbers = #tpu.dot_dimension_numbers<[1], [0], [0], [1], [0, 0, 1, 1], [], []>} : vector<8x8xf32>, vector<8x8xf32>, vector<8x8xf32> -> vector<8x8xf32>
    %65 = vector.extract_strided_slice %45 {offsets = [0, 8], sizes = [8, 8], strides = [1, 1]} : vector<8x128xf32> to vector<8x8xf32>
    %66 = vector.extract_strided_slice %45 {offsets = [0, 40], sizes = [8, 8], strides = [1, 1]} : vector<8x128xf32> to vector<8x8xf32>
    %67 = vector.extract_strided_slice %45 {offsets = [0, 72], sizes = [8, 8], strides = [1, 1]} : vector<8x128xf32> to vector<8x8xf32>
    %68 = tpu.transpose %66, [1, 0] : vector<8x8xf32> -> vector<8x8xf32>
    %cst_25 = arith.constant dense<0.000000e+00> : vector<8x8xf32>
    %69 = tpu.matmul %65, %68, %cst_25 {dimension_numbers = #tpu.dot_dimension_numbers<[1], [0], [0], [1], [0, 0, 1, 1], [], []>} : vector<8x8xf32>, vector<8x8xf32>, vector<8x8xf32> -> vector<8x8xf32>
    %cst_26 = arith.constant 0.353553385 : f32
    %70 = vector.broadcast %cst_26 : f32 to vector<8x8xf32>
    %71 = arith.mulf %69, %70 : vector<8x8xf32>
    %72 = arith.addf %71, %15 : vector<8x8xf32>
    %cst_27 = arith.constant dense<0xFF800000> : vector<8xf32>
    %73 = vector.multi_reduction <maximumf>, %72, %cst_27 [1] : vector<8x8xf32> to vector<8xf32>
    %74 = vector.shape_cast %73 : vector<8xf32> to vector<8x1xf32>
    %75 = vector.broadcast %74 : vector<8x1xf32> to vector<8x8xf32>
    %76 = arith.subf %72, %75 : vector<8x8xf32>
    %77 = math.exp %76 : vector<8x8xf32>
    %cst_28 = arith.constant dense<0.000000e+00> : vector<8xf32>
    %78 = vector.multi_reduction <add>, %77, %cst_28 [1] : vector<8x8xf32> to vector<8xf32>
    %79 = vector.shape_cast %78 : vector<8xf32> to vector<8x1xf32>
    %80 = tpu.reciprocal %79 {approx = true} : vector<8x1xf32> -> vector<8x1xf32>
    %81 = vector.broadcast %80 : vector<8x1xf32> to vector<8x8xf32>
    %82 = arith.mulf %77, %81 : vector<8x8xf32>
    %cst_29 = arith.constant dense<0.000000e+00> : vector<8x8xf32>
    %83 = tpu.matmul %82, %67, %cst_29 {dimension_numbers = #tpu.dot_dimension_numbers<[1], [0], [0], [1], [0, 0, 1, 1], [], []>} : vector<8x8xf32>, vector<8x8xf32>, vector<8x8xf32> -> vector<8x8xf32>
    %84 = vector.extract_strided_slice %45 {offsets = [0, 16], sizes = [8, 8], strides = [1, 1]} : vector<8x128xf32> to vector<8x8xf32>
    %85 = vector.extract_strided_slice %45 {offsets = [0, 48], sizes = [8, 8], strides = [1, 1]} : vector<8x128xf32> to vector<8x8xf32>
    %86 = vector.extract_strided_slice %45 {offsets = [0, 80], sizes = [8, 8], strides = [1, 1]} : vector<8x128xf32> to vector<8x8xf32>
    %87 = tpu.transpose %85, [1, 0] : vector<8x8xf32> -> vector<8x8xf32>
    %cst_30 = arith.constant dense<0.000000e+00> : vector<8x8xf32>
    %88 = tpu.matmul %84, %87, %cst_30 {dimension_numbers = #tpu.dot_dimension_numbers<[1], [0], [0], [1], [0, 0, 1, 1], [], []>} : vector<8x8xf32>, vector<8x8xf32>, vector<8x8xf32> -> vector<8x8xf32>
    %cst_31 = arith.constant 0.353553385 : f32
    %89 = vector.broadcast %cst_31 : f32 to vector<8x8xf32>
    %90 = arith.mulf %88, %89 : vector<8x8xf32>
    %91 = arith.addf %90, %15 : vector<8x8xf32>
    %cst_32 = arith.constant dense<0xFF800000> : vector<8xf32>
    %92 = vector.multi_reduction <maximumf>, %91, %cst_32 [1] : vector<8x8xf32> to vector<8xf32>
    %93 = vector.shape_cast %92 : vector<8xf32> to vector<8x1xf32>
    %94 = vector.broadcast %93 : vector<8x1xf32> to vector<8x8xf32>
    %95 = arith.subf %91, %94 : vector<8x8xf32>
    %96 = math.exp %95 : vector<8x8xf32>
    %cst_33 = arith.constant dense<0.000000e+00> : vector<8xf32>
    %97 = vector.multi_reduction <add>, %96, %cst_33 [1] : vector<8x8xf32> to vector<8xf32>
    %98 = vector.shape_cast %97 : vector<8xf32> to vector<8x1xf32>
    %99 = tpu.reciprocal %98 {approx = true} : vector<8x1xf32> -> vector<8x1xf32>
    %100 = vector.broadcast %99 : vector<8x1xf32> to vector<8x8xf32>
    %101 = arith.mulf %96, %100 : vector<8x8xf32>
    %cst_34 = arith.constant dense<0.000000e+00> : vector<8x8xf32>
    %102 = tpu.matmul %101, %86, %cst_34 {dimension_numbers = #tpu.dot_dimension_numbers<[1], [0], [0], [1], [0, 0, 1, 1], [], []>} : vector<8x8xf32>, vector<8x8xf32>, vector<8x8xf32> -> vector<8x8xf32>
    %103 = vector.extract_strided_slice %45 {offsets = [0, 24], sizes = [8, 8], strides = [1, 1]} : vector<8x128xf32> to vector<8x8xf32>
    %104 = vector.extract_strided_slice %45 {offsets = [0, 56], sizes = [8, 8], strides = [1, 1]} : vector<8x128xf32> to vector<8x8xf32>
    %105 = vector.extract_strided_slice %45 {offsets = [0, 88], sizes = [8, 8], strides = [1, 1]} : vector<8x128xf32> to vector<8x8xf32>
    %106 = tpu.transpose %104, [1, 0] : vector<8x8xf32> -> vector<8x8xf32>
    %cst_35 = arith.constant dense<0.000000e+00> : vector<8x8xf32>
    %107 = tpu.matmul %103, %106, %cst_35 {dimension_numbers = #tpu.dot_dimension_numbers<[1], [0], [0], [1], [0, 0, 1, 1], [], []>} : vector<8x8xf32>, vector<8x8xf32>, vector<8x8xf32> -> vector<8x8xf32>
    %cst_36 = arith.constant 0.353553385 : f32
    %108 = vector.broadcast %cst_36 : f32 to vector<8x8xf32>
    %109 = arith.mulf %107, %108 : vector<8x8xf32>
    %110 = arith.addf %109, %15 : vector<8x8xf32>
    %cst_37 = arith.constant dense<0xFF800000> : vector<8xf32>
    %111 = vector.multi_reduction <maximumf>, %110, %cst_37 [1] : vector<8x8xf32> to vector<8xf32>
    %112 = vector.shape_cast %111 : vector<8xf32> to vector<8x1xf32>
    %113 = vector.broadcast %112 : vector<8x1xf32> to vector<8x8xf32>
    %114 = arith.subf %110, %113 : vector<8x8xf32>
    %115 = math.exp %114 : vector<8x8xf32>
    %cst_38 = arith.constant dense<0.000000e+00> : vector<8xf32>
    %116 = vector.multi_reduction <add>, %115, %cst_38 [1] : vector<8x8xf32> to vector<8xf32>
    %117 = vector.shape_cast %116 : vector<8xf32> to vector<8x1xf32>
    %118 = tpu.reciprocal %117 {approx = true} : vector<8x1xf32> -> vector<8x1xf32>
    %119 = vector.broadcast %118 : vector<8x1xf32> to vector<8x8xf32>
    %120 = arith.mulf %115, %119 : vector<8x8xf32>
    %cst_39 = arith.constant dense<0.000000e+00> : vector<8x8xf32>
    %121 = tpu.matmul %120, %105, %cst_39 {dimension_numbers = #tpu.dot_dimension_numbers<[1], [0], [0], [1], [0, 0, 1, 1], [], []>} : vector<8x8xf32>, vector<8x8xf32>, vector<8x8xf32> -> vector<8x8xf32>
    %122 = tpu.concatenate %64, %83, %102, %121 in 1 : vector<8x8xf32>, vector<8x8xf32>, vector<8x8xf32>, vector<8x8xf32> -> vector<8x32xf32>
    %c0_40 = arith.constant 0 : index
    %c0_41 = arith.constant 0 : index
    %c0_42 = arith.constant 0 : index
    %123 = vector.load %arg5[%c0_40, %c0_41, %c0_42] : memref<2x32x32xf32, #tpu.memory_space<vmem>>, vector<1x32x32xf32>
    %124 = vector.shape_cast %123 : vector<1x32x32xf32> to vector<32x32xf32>
    %cst_43 = arith.constant dense<0.000000e+00> : vector<8x32xf32>
    %125 = tpu.matmul %122, %124, %cst_43 {dimension_numbers = #tpu.dot_dimension_numbers<[1], [0], [0], [1], [0, 0, 1, 1], [], []>} : vector<8x32xf32>, vector<32x32xf32>, vector<8x32xf32> -> vector<8x32xf32>
    %126 = arith.addf %9, %125 : vector<8x32xf32>
    %c3 = arith.constant 3 : index
    %c0_44 = arith.constant 0 : index
    %127 = vector.load %arg8[%c3, %c0_44] : memref<18x128xf32, #tpu.memory_space<vmem>>, vector<1x32xf32>
    %128 = vector.broadcast %127 : vector<1x32xf32> to vector<8x32xf32>
    %129 = arith.addf %126, %128 : vector<8x32xf32>
    %c4 = arith.constant 4 : index
    %c0_45 = arith.constant 0 : index
    %130 = vector.load %arg8[%c4, %c0_45] : memref<18x128xf32, #tpu.memory_space<vmem>>, vector<1x32xf32>
    %c5 = arith.constant 5 : index
    %c0_46 = arith.constant 0 : index
    %131 = vector.load %arg8[%c5, %c0_46] : memref<18x128xf32, #tpu.memory_space<vmem>>, vector<1x32xf32>
    %cst_47 = arith.constant dense<0.000000e+00> : vector<8xf32>
    %132 = vector.multi_reduction <add>, %129, %cst_47 [1] : vector<8x32xf32> to vector<8xf32>
    %133 = vector.shape_cast %132 : vector<8xf32> to vector<8x1xf32>
    %cst_48 = arith.constant 3.200000e+01 : f32
    %134 = vector.broadcast %cst_48 : f32 to vector<8x1xf32>
    %135 = arith.divf %133, %134 : vector<8x1xf32>
    %136 = vector.broadcast %135 : vector<8x1xf32> to vector<8x32xf32>
    %137 = arith.subf %129, %136 : vector<8x32xf32>
    %138 = arith.mulf %137, %137 : vector<8x32xf32>
    %cst_49 = arith.constant dense<0.000000e+00> : vector<8xf32>
    %139 = vector.multi_reduction <add>, %138, %cst_49 [1] : vector<8x32xf32> to vector<8xf32>
    %140 = vector.shape_cast %139 : vector<8xf32> to vector<8x1xf32>
    %cst_50 = arith.constant 3.200000e+01 : f32
    %141 = vector.broadcast %cst_50 : f32 to vector<8x1xf32>
    %142 = arith.divf %140, %141 : vector<8x1xf32>
    %143 = vector.broadcast %135 : vector<8x1xf32> to vector<8x32xf32>
    %144 = arith.subf %129, %143 : vector<8x32xf32>
    %cst_51 = arith.constant 9.99999974E-6 : f32
    %145 = vector.broadcast %cst_51 : f32 to vector<8x1xf32>
    %146 = arith.addf %142, %145 : vector<8x1xf32>
    %147 = math.rsqrt %146 : vector<8x1xf32>
    %148 = vector.broadcast %147 : vector<8x1xf32> to vector<8x32xf32>
    %149 = arith.mulf %144, %148 : vector<8x32xf32>
    %150 = vector.broadcast %130 : vector<1x32xf32> to vector<8x32xf32>
    %151 = arith.mulf %149, %150 : vector<8x32xf32>
    %152 = vector.broadcast %131 : vector<1x32xf32> to vector<8x32xf32>
    %153 = arith.addf %151, %152 : vector<8x32xf32>
    %c0_52 = arith.constant 0 : index
    %c0_53 = arith.constant 0 : index
    %c0_54 = arith.constant 0 : index
    %154 = vector.load %arg6[%c0_52, %c0_53, %c0_54] : memref<2x32x128xf32, #tpu.memory_space<vmem>>, vector<1x32x128xf32>
    %155 = vector.shape_cast %154 : vector<1x32x128xf32> to vector<32x128xf32>
    %cst_55 = arith.constant dense<0.000000e+00> : vector<8x128xf32>
    %156 = tpu.matmul %153, %155, %cst_55 {dimension_numbers = #tpu.dot_dimension_numbers<[1], [0], [0], [1], [0, 0, 1, 1], [], []>} : vector<8x32xf32>, vector<32x128xf32>, vector<8x128xf32> -> vector<8x128xf32>
    %c6 = arith.constant 6 : index
    %c0_56 = arith.constant 0 : index
    %157 = vector.load %arg8[%c6, %c0_56] : memref<18x128xf32, #tpu.memory_space<vmem>>, vector<1x128xf32>
    %158 = vector.broadcast %157 : vector<1x128xf32> to vector<8x128xf32>
    %159 = arith.addf %156, %158 : vector<8x128xf32>
    %cst_57 = arith.constant 5.000000e-01 : f32
    %160 = vector.broadcast %cst_57 : f32 to vector<8x128xf32>
    %161 = arith.mulf %160, %159 : vector<8x128xf32>
    %cst_58 = arith.constant 4.471500e-02 : f32
    %162 = vector.broadcast %cst_58 : f32 to vector<8x128xf32>
    %163 = arith.mulf %162, %159 : vector<8x128xf32>
    %164 = arith.mulf %163, %159 : vector<8x128xf32>
    %165 = arith.mulf %164, %159 : vector<8x128xf32>
    %166 = arith.addf %159, %165 : vector<8x128xf32>
    %cst_59 = arith.constant 0.797884583 : f32
    %167 = vector.broadcast %cst_59 : f32 to vector<8x128xf32>
    %168 = arith.mulf %167, %166 : vector<8x128xf32>
    %169 = math.tanh %168 : vector<8x128xf32>
    %cst_60 = arith.constant 1.000000e+00 : f32
    %170 = vector.broadcast %cst_60 : f32 to vector<8x128xf32>
    %171 = arith.addf %170, %169 : vector<8x128xf32>
    %172 = arith.mulf %161, %171 : vector<8x128xf32>
    %c0_61 = arith.constant 0 : index
    %c0_62 = arith.constant 0 : index
    %c0_63 = arith.constant 0 : index
    %173 = vector.load %arg7[%c0_61, %c0_62, %c0_63] : memref<2x128x32xf32, #tpu.memory_space<vmem>>, vector<1x128x32xf32>
    %174 = vector.shape_cast %173 : vector<1x128x32xf32> to vector<128x32xf32>
    %cst_64 = arith.constant dense<0.000000e+00> : vector<8x32xf32>
    %175 = tpu.matmul %172, %174, %cst_64 {dimension_numbers = #tpu.dot_dimension_numbers<[1], [0], [0], [1], [0, 0, 1, 1], [], []>} : vector<8x128xf32>, vector<128x32xf32>, vector<8x32xf32> -> vector<8x32xf32>
    %176 = arith.addf %129, %175 : vector<8x32xf32>
    %c7 = arith.constant 7 : index
    %c0_65 = arith.constant 0 : index
    %177 = vector.load %arg8[%c7, %c0_65] : memref<18x128xf32, #tpu.memory_space<vmem>>, vector<1x32xf32>
    %178 = vector.broadcast %177 : vector<1x32xf32> to vector<8x32xf32>
    %179 = arith.addf %176, %178 : vector<8x32xf32>
    %c8 = arith.constant 8 : index
    %c0_66 = arith.constant 0 : index
    %180 = vector.load %arg8[%c8, %c0_66] : memref<18x128xf32, #tpu.memory_space<vmem>>, vector<1x32xf32>
    %c9 = arith.constant 9 : index
    %c0_67 = arith.constant 0 : index
    %181 = vector.load %arg8[%c9, %c0_67] : memref<18x128xf32, #tpu.memory_space<vmem>>, vector<1x32xf32>
    %cst_68 = arith.constant dense<0.000000e+00> : vector<8xf32>
    %182 = vector.multi_reduction <add>, %179, %cst_68 [1] : vector<8x32xf32> to vector<8xf32>
    %183 = vector.shape_cast %182 : vector<8xf32> to vector<8x1xf32>
    %cst_69 = arith.constant 3.200000e+01 : f32
    %184 = vector.broadcast %cst_69 : f32 to vector<8x1xf32>
    %185 = arith.divf %183, %184 : vector<8x1xf32>
    %186 = vector.broadcast %185 : vector<8x1xf32> to vector<8x32xf32>
    %187 = arith.subf %179, %186 : vector<8x32xf32>
    %188 = arith.mulf %187, %187 : vector<8x32xf32>
    %cst_70 = arith.constant dense<0.000000e+00> : vector<8xf32>
    %189 = vector.multi_reduction <add>, %188, %cst_70 [1] : vector<8x32xf32> to vector<8xf32>
    %190 = vector.shape_cast %189 : vector<8xf32> to vector<8x1xf32>
    %cst_71 = arith.constant 3.200000e+01 : f32
    %191 = vector.broadcast %cst_71 : f32 to vector<8x1xf32>
    %192 = arith.divf %190, %191 : vector<8x1xf32>
    %193 = vector.broadcast %185 : vector<8x1xf32> to vector<8x32xf32>
    %194 = arith.subf %179, %193 : vector<8x32xf32>
    %cst_72 = arith.constant 9.99999974E-6 : f32
    %195 = vector.broadcast %cst_72 : f32 to vector<8x1xf32>
    %196 = arith.addf %192, %195 : vector<8x1xf32>
    %197 = math.rsqrt %196 : vector<8x1xf32>
    %198 = vector.broadcast %197 : vector<8x1xf32> to vector<8x32xf32>
    %199 = arith.mulf %194, %198 : vector<8x32xf32>
    %200 = vector.broadcast %180 : vector<1x32xf32> to vector<8x32xf32>
    %201 = arith.mulf %199, %200 : vector<8x32xf32>
    %202 = vector.broadcast %181 : vector<1x32xf32> to vector<8x32xf32>
    %203 = arith.addf %201, %202 : vector<8x32xf32>
    %c1_73 = arith.constant 1 : index
    %c0_74 = arith.constant 0 : index
    %c0_75 = arith.constant 0 : index
    %204 = vector.load %arg4[%c1_73, %c0_74, %c0_75] : memref<2x32x128xf32, #tpu.memory_space<vmem>>, vector<1x32x128xf32>
    %205 = vector.shape_cast %204 : vector<1x32x128xf32> to vector<32x128xf32>
    %cst_76 = arith.constant dense<0.000000e+00> : vector<8x128xf32>
    %206 = tpu.matmul %203, %205, %cst_76 {dimension_numbers = #tpu.dot_dimension_numbers<[1], [0], [0], [1], [0, 0, 1, 1], [], []>} : vector<8x32xf32>, vector<32x128xf32>, vector<8x128xf32> -> vector<8x128xf32>
    %c10 = arith.constant 10 : index
    %c0_77 = arith.constant 0 : index
    %207 = vector.load %arg8[%c10, %c0_77] : memref<18x128xf32, #tpu.memory_space<vmem>>, vector<1x128xf32>
    %208 = vector.broadcast %207 : vector<1x128xf32> to vector<8x128xf32>
    %209 = arith.addf %206, %208 : vector<8x128xf32>
    %210 = vector.extract_strided_slice %209 {offsets = [0, 0], sizes = [8, 8], strides = [1, 1]} : vector<8x128xf32> to vector<8x8xf32>
    %211 = vector.extract_strided_slice %209 {offsets = [0, 32], sizes = [8, 8], strides = [1, 1]} : vector<8x128xf32> to vector<8x8xf32>
    %212 = vector.extract_strided_slice %209 {offsets = [0, 64], sizes = [8, 8], strides = [1, 1]} : vector<8x128xf32> to vector<8x8xf32>
    %213 = tpu.transpose %211, [1, 0] : vector<8x8xf32> -> vector<8x8xf32>
    %cst_78 = arith.constant dense<0.000000e+00> : vector<8x8xf32>
    %214 = tpu.matmul %210, %213, %cst_78 {dimension_numbers = #tpu.dot_dimension_numbers<[1], [0], [0], [1], [0, 0, 1, 1], [], []>} : vector<8x8xf32>, vector<8x8xf32>, vector<8x8xf32> -> vector<8x8xf32>
    %cst_79 = arith.constant 0.353553385 : f32
    %215 = vector.broadcast %cst_79 : f32 to vector<8x8xf32>
    %216 = arith.mulf %214, %215 : vector<8x8xf32>
    %217 = arith.addf %216, %15 : vector<8x8xf32>
    %cst_80 = arith.constant dense<0xFF800000> : vector<8xf32>
    %218 = vector.multi_reduction <maximumf>, %217, %cst_80 [1] : vector<8x8xf32> to vector<8xf32>
    %219 = vector.shape_cast %218 : vector<8xf32> to vector<8x1xf32>
    %220 = vector.broadcast %219 : vector<8x1xf32> to vector<8x8xf32>
    %221 = arith.subf %217, %220 : vector<8x8xf32>
    %222 = math.exp %221 : vector<8x8xf32>
    %cst_81 = arith.constant dense<0.000000e+00> : vector<8xf32>
    %223 = vector.multi_reduction <add>, %222, %cst_81 [1] : vector<8x8xf32> to vector<8xf32>
    %224 = vector.shape_cast %223 : vector<8xf32> to vector<8x1xf32>
    %225 = tpu.reciprocal %224 {approx = true} : vector<8x1xf32> -> vector<8x1xf32>
    %226 = vector.broadcast %225 : vector<8x1xf32> to vector<8x8xf32>
    %227 = arith.mulf %222, %226 : vector<8x8xf32>
    %cst_82 = arith.constant dense<0.000000e+00> : vector<8x8xf32>
    %228 = tpu.matmul %227, %212, %cst_82 {dimension_numbers = #tpu.dot_dimension_numbers<[1], [0], [0], [1], [0, 0, 1, 1], [], []>} : vector<8x8xf32>, vector<8x8xf32>, vector<8x8xf32> -> vector<8x8xf32>
    %229 = vector.extract_strided_slice %209 {offsets = [0, 8], sizes = [8, 8], strides = [1, 1]} : vector<8x128xf32> to vector<8x8xf32>
    %230 = vector.extract_strided_slice %209 {offsets = [0, 40], sizes = [8, 8], strides = [1, 1]} : vector<8x128xf32> to vector<8x8xf32>
    %231 = vector.extract_strided_slice %209 {offsets = [0, 72], sizes = [8, 8], strides = [1, 1]} : vector<8x128xf32> to vector<8x8xf32>
    %232 = tpu.transpose %230, [1, 0] : vector<8x8xf32> -> vector<8x8xf32>
    %cst_83 = arith.constant dense<0.000000e+00> : vector<8x8xf32>
    %233 = tpu.matmul %229, %232, %cst_83 {dimension_numbers = #tpu.dot_dimension_numbers<[1], [0], [0], [1], [0, 0, 1, 1], [], []>} : vector<8x8xf32>, vector<8x8xf32>, vector<8x8xf32> -> vector<8x8xf32>
    %cst_84 = arith.constant 0.353553385 : f32
    %234 = vector.broadcast %cst_84 : f32 to vector<8x8xf32>
    %235 = arith.mulf %233, %234 : vector<8x8xf32>
    %236 = arith.addf %235, %15 : vector<8x8xf32>
    %cst_85 = arith.constant dense<0xFF800000> : vector<8xf32>
    %237 = vector.multi_reduction <maximumf>, %236, %cst_85 [1] : vector<8x8xf32> to vector<8xf32>
    %238 = vector.shape_cast %237 : vector<8xf32> to vector<8x1xf32>
    %239 = vector.broadcast %238 : vector<8x1xf32> to vector<8x8xf32>
    %240 = arith.subf %236, %239 : vector<8x8xf32>
    %241 = math.exp %240 : vector<8x8xf32>
    %cst_86 = arith.constant dense<0.000000e+00> : vector<8xf32>
    %242 = vector.multi_reduction <add>, %241, %cst_86 [1] : vector<8x8xf32> to vector<8xf32>
    %243 = vector.shape_cast %242 : vector<8xf32> to vector<8x1xf32>
    %244 = tpu.reciprocal %243 {approx = true} : vector<8x1xf32> -> vector<8x1xf32>
    %245 = vector.broadcast %244 : vector<8x1xf32> to vector<8x8xf32>
    %246 = arith.mulf %241, %245 : vector<8x8xf32>
    %cst_87 = arith.constant dense<0.000000e+00> : vector<8x8xf32>
    %247 = tpu.matmul %246, %231, %cst_87 {dimension_numbers = #tpu.dot_dimension_numbers<[1], [0], [0], [1], [0, 0, 1, 1], [], []>} : vector<8x8xf32>, vector<8x8xf32>, vector<8x8xf32> -> vector<8x8xf32>
    %248 = vector.extract_strided_slice %209 {offsets = [0, 16], sizes = [8, 8], strides = [1, 1]} : vector<8x128xf32> to vector<8x8xf32>
    %249 = vector.extract_strided_slice %209 {offsets = [0, 48], sizes = [8, 8], strides = [1, 1]} : vector<8x128xf32> to vector<8x8xf32>
    %250 = vector.extract_strided_slice %209 {offsets = [0, 80], sizes = [8, 8], strides = [1, 1]} : vector<8x128xf32> to vector<8x8xf32>
    %251 = tpu.transpose %249, [1, 0] : vector<8x8xf32> -> vector<8x8xf32>
    %cst_88 = arith.constant dense<0.000000e+00> : vector<8x8xf32>
    %252 = tpu.matmul %248, %251, %cst_88 {dimension_numbers = #tpu.dot_dimension_numbers<[1], [0], [0], [1], [0, 0, 1, 1], [], []>} : vector<8x8xf32>, vector<8x8xf32>, vector<8x8xf32> -> vector<8x8xf32>
    %cst_89 = arith.constant 0.353553385 : f32
    %253 = vector.broadcast %cst_89 : f32 to vector<8x8xf32>
    %254 = arith.mulf %252, %253 : vector<8x8xf32>
    %255 = arith.addf %254, %15 : vector<8x8xf32>
    %cst_90 = arith.constant dense<0xFF800000> : vector<8xf32>
    %256 = vector.multi_reduction <maximumf>, %255, %cst_90 [1] : vector<8x8xf32> to vector<8xf32>
    %257 = vector.shape_cast %256 : vector<8xf32> to vector<8x1xf32>
    %258 = vector.broadcast %257 : vector<8x1xf32> to vector<8x8xf32>
    %259 = arith.subf %255, %258 : vector<8x8xf32>
    %260 = math.exp %259 : vector<8x8xf32>
    %cst_91 = arith.constant dense<0.000000e+00> : vector<8xf32>
    %261 = vector.multi_reduction <add>, %260, %cst_91 [1] : vector<8x8xf32> to vector<8xf32>
    %262 = vector.shape_cast %261 : vector<8xf32> to vector<8x1xf32>
    %263 = tpu.reciprocal %262 {approx = true} : vector<8x1xf32> -> vector<8x1xf32>
    %264 = vector.broadcast %263 : vector<8x1xf32> to vector<8x8xf32>
    %265 = arith.mulf %260, %264 : vector<8x8xf32>
    %cst_92 = arith.constant dense<0.000000e+00> : vector<8x8xf32>
    %266 = tpu.matmul %265, %250, %cst_92 {dimension_numbers = #tpu.dot_dimension_numbers<[1], [0], [0], [1], [0, 0, 1, 1], [], []>} : vector<8x8xf32>, vector<8x8xf32>, vector<8x8xf32> -> vector<8x8xf32>
    %267 = vector.extract_strided_slice %209 {offsets = [0, 24], sizes = [8, 8], strides = [1, 1]} : vector<8x128xf32> to vector<8x8xf32>
    %268 = vector.extract_strided_slice %209 {offsets = [0, 56], sizes = [8, 8], strides = [1, 1]} : vector<8x128xf32> to vector<8x8xf32>
    %269 = vector.extract_strided_slice %209 {offsets = [0, 88], sizes = [8, 8], strides = [1, 1]} : vector<8x128xf32> to vector<8x8xf32>
    %270 = tpu.transpose %268, [1, 0] : vector<8x8xf32> -> vector<8x8xf32>
    %cst_93 = arith.constant dense<0.000000e+00> : vector<8x8xf32>
    %271 = tpu.matmul %267, %270, %cst_93 {dimension_numbers = #tpu.dot_dimension_numbers<[1], [0], [0], [1], [0, 0, 1, 1], [], []>} : vector<8x8xf32>, vector<8x8xf32>, vector<8x8xf32> -> vector<8x8xf32>
    %cst_94 = arith.constant 0.353553385 : f32
    %272 = vector.broadcast %cst_94 : f32 to vector<8x8xf32>
    %273 = arith.mulf %271, %272 : vector<8x8xf32>
    %274 = arith.addf %273, %15 : vector<8x8xf32>
    %cst_95 = arith.constant dense<0xFF800000> : vector<8xf32>
    %275 = vector.multi_reduction <maximumf>, %274, %cst_95 [1] : vector<8x8xf32> to vector<8xf32>
    %276 = vector.shape_cast %275 : vector<8xf32> to vector<8x1xf32>
    %277 = vector.broadcast %276 : vector<8x1xf32> to vector<8x8xf32>
    %278 = arith.subf %274, %277 : vector<8x8xf32>
    %279 = math.exp %278 : vector<8x8xf32>
    %cst_96 = arith.constant dense<0.000000e+00> : vector<8xf32>
    %280 = vector.multi_reduction <add>, %279, %cst_96 [1] : vector<8x8xf32> to vector<8xf32>
    %281 = vector.shape_cast %280 : vector<8xf32> to vector<8x1xf32>
    %282 = tpu.reciprocal %281 {approx = true} : vector<8x1xf32> -> vector<8x1xf32>
    %283 = vector.broadcast %282 : vector<8x1xf32> to vector<8x8xf32>
    %284 = arith.mulf %279, %283 : vector<8x8xf32>
    %cst_97 = arith.constant dense<0.000000e+00> : vector<8x8xf32>
    %285 = tpu.matmul %284, %269, %cst_97 {dimension_numbers = #tpu.dot_dimension_numbers<[1], [0], [0], [1], [0, 0, 1, 1], [], []>} : vector<8x8xf32>, vector<8x8xf32>, vector<8x8xf32> -> vector<8x8xf32>
    %286 = tpu.concatenate %228, %247, %266, %285 in 1 : vector<8x8xf32>, vector<8x8xf32>, vector<8x8xf32>, vector<8x8xf32> -> vector<8x32xf32>
    %c1_98 = arith.constant 1 : index
    %c0_99 = arith.constant 0 : index
    %c0_100 = arith.constant 0 : index
    %287 = vector.load %arg5[%c1_98, %c0_99, %c0_100] : memref<2x32x32xf32, #tpu.memory_space<vmem>>, vector<1x32x32xf32>
    %288 = vector.shape_cast %287 : vector<1x32x32xf32> to vector<32x32xf32>
    %cst_101 = arith.constant dense<0.000000e+00> : vector<8x32xf32>
    %289 = tpu.matmul %286, %288, %cst_101 {dimension_numbers = #tpu.dot_dimension_numbers<[1], [0], [0], [1], [0, 0, 1, 1], [], []>} : vector<8x32xf32>, vector<32x32xf32>, vector<8x32xf32> -> vector<8x32xf32>
    %290 = arith.addf %179, %289 : vector<8x32xf32>
    %c11 = arith.constant 11 : index
    %c0_102 = arith.constant 0 : index
    %291 = vector.load %arg8[%c11, %c0_102] : memref<18x128xf32, #tpu.memory_space<vmem>>, vector<1x32xf32>
    %292 = vector.broadcast %291 : vector<1x32xf32> to vector<8x32xf32>
    %293 = arith.addf %290, %292 : vector<8x32xf32>
    %c12 = arith.constant 12 : index
    %c0_103 = arith.constant 0 : index
    %294 = vector.load %arg8[%c12, %c0_103] : memref<18x128xf32, #tpu.memory_space<vmem>>, vector<1x32xf32>
    %c13 = arith.constant 13 : index
    %c0_104 = arith.constant 0 : index
    %295 = vector.load %arg8[%c13, %c0_104] : memref<18x128xf32, #tpu.memory_space<vmem>>, vector<1x32xf32>
    %cst_105 = arith.constant dense<0.000000e+00> : vector<8xf32>
    %296 = vector.multi_reduction <add>, %293, %cst_105 [1] : vector<8x32xf32> to vector<8xf32>
    %297 = vector.shape_cast %296 : vector<8xf32> to vector<8x1xf32>
    %cst_106 = arith.constant 3.200000e+01 : f32
    %298 = vector.broadcast %cst_106 : f32 to vector<8x1xf32>
    %299 = arith.divf %297, %298 : vector<8x1xf32>
    %300 = vector.broadcast %299 : vector<8x1xf32> to vector<8x32xf32>
    %301 = arith.subf %293, %300 : vector<8x32xf32>
    %302 = arith.mulf %301, %301 : vector<8x32xf32>
    %cst_107 = arith.constant dense<0.000000e+00> : vector<8xf32>
    %303 = vector.multi_reduction <add>, %302, %cst_107 [1] : vector<8x32xf32> to vector<8xf32>
    %304 = vector.shape_cast %303 : vector<8xf32> to vector<8x1xf32>
    %cst_108 = arith.constant 3.200000e+01 : f32
    %305 = vector.broadcast %cst_108 : f32 to vector<8x1xf32>
    %306 = arith.divf %304, %305 : vector<8x1xf32>
    %307 = vector.broadcast %299 : vector<8x1xf32> to vector<8x32xf32>
    %308 = arith.subf %293, %307 : vector<8x32xf32>
    %cst_109 = arith.constant 9.99999974E-6 : f32
    %309 = vector.broadcast %cst_109 : f32 to vector<8x1xf32>
    %310 = arith.addf %306, %309 : vector<8x1xf32>
    %311 = math.rsqrt %310 : vector<8x1xf32>
    %312 = vector.broadcast %311 : vector<8x1xf32> to vector<8x32xf32>
    %313 = arith.mulf %308, %312 : vector<8x32xf32>
    %314 = vector.broadcast %294 : vector<1x32xf32> to vector<8x32xf32>
    %315 = arith.mulf %313, %314 : vector<8x32xf32>
    %316 = vector.broadcast %295 : vector<1x32xf32> to vector<8x32xf32>
    %317 = arith.addf %315, %316 : vector<8x32xf32>
    %c1_110 = arith.constant 1 : index
    %c0_111 = arith.constant 0 : index
    %c0_112 = arith.constant 0 : index
    %318 = vector.load %arg6[%c1_110, %c0_111, %c0_112] : memref<2x32x128xf32, #tpu.memory_space<vmem>>, vector<1x32x128xf32>
    %319 = vector.shape_cast %318 : vector<1x32x128xf32> to vector<32x128xf32>
    %cst_113 = arith.constant dense<0.000000e+00> : vector<8x128xf32>
    %320 = tpu.matmul %317, %319, %cst_113 {dimension_numbers = #tpu.dot_dimension_numbers<[1], [0], [0], [1], [0, 0, 1, 1], [], []>} : vector<8x32xf32>, vector<32x128xf32>, vector<8x128xf32> -> vector<8x128xf32>
    %c14 = arith.constant 14 : index
    %c0_114 = arith.constant 0 : index
    %321 = vector.load %arg8[%c14, %c0_114] : memref<18x128xf32, #tpu.memory_space<vmem>>, vector<1x128xf32>
    %322 = vector.broadcast %321 : vector<1x128xf32> to vector<8x128xf32>
    %323 = arith.addf %320, %322 : vector<8x128xf32>
    %cst_115 = arith.constant 5.000000e-01 : f32
    %324 = vector.broadcast %cst_115 : f32 to vector<8x128xf32>
    %325 = arith.mulf %324, %323 : vector<8x128xf32>
    %cst_116 = arith.constant 4.471500e-02 : f32
    %326 = vector.broadcast %cst_116 : f32 to vector<8x128xf32>
    %327 = arith.mulf %326, %323 : vector<8x128xf32>
    %328 = arith.mulf %327, %323 : vector<8x128xf32>
    %329 = arith.mulf %328, %323 : vector<8x128xf32>
    %330 = arith.addf %323, %329 : vector<8x128xf32>
    %cst_117 = arith.constant 0.797884583 : f32
    %331 = vector.broadcast %cst_117 : f32 to vector<8x128xf32>
    %332 = arith.mulf %331, %330 : vector<8x128xf32>
    %333 = math.tanh %332 : vector<8x128xf32>
    %cst_118 = arith.constant 1.000000e+00 : f32
    %334 = vector.broadcast %cst_118 : f32 to vector<8x128xf32>
    %335 = arith.addf %334, %333 : vector<8x128xf32>
    %336 = arith.mulf %325, %335 : vector<8x128xf32>
    %c1_119 = arith.constant 1 : index
    %c0_120 = arith.constant 0 : index
    %c0_121 = arith.constant 0 : index
    %337 = vector.load %arg7[%c1_119, %c0_120, %c0_121] : memref<2x128x32xf32, #tpu.memory_space<vmem>>, vector<1x128x32xf32>
    %338 = vector.shape_cast %337 : vector<1x128x32xf32> to vector<128x32xf32>
    %cst_122 = arith.constant dense<0.000000e+00> : vector<8x32xf32>
    %339 = tpu.matmul %336, %338, %cst_122 {dimension_numbers = #tpu.dot_dimension_numbers<[1], [0], [0], [1], [0, 0, 1, 1], [], []>} : vector<8x128xf32>, vector<128x32xf32>, vector<8x32xf32> -> vector<8x32xf32>
    %340 = arith.addf %293, %339 : vector<8x32xf32>
    %c15 = arith.constant 15 : index
    %c0_123 = arith.constant 0 : index
    %341 = vector.load %arg8[%c15, %c0_123] : memref<18x128xf32, #tpu.memory_space<vmem>>, vector<1x32xf32>
    %342 = vector.broadcast %341 : vector<1x32xf32> to vector<8x32xf32>
    %343 = arith.addf %340, %342 : vector<8x32xf32>
    %c16 = arith.constant 16 : index
    %c0_124 = arith.constant 0 : index
    %344 = vector.load %arg8[%c16, %c0_124] : memref<18x128xf32, #tpu.memory_space<vmem>>, vector<1x32xf32>
    %c17 = arith.constant 17 : index
    %c0_125 = arith.constant 0 : index
    %345 = vector.load %arg8[%c17, %c0_125] : memref<18x128xf32, #tpu.memory_space<vmem>>, vector<1x32xf32>
    %cst_126 = arith.constant dense<0.000000e+00> : vector<8xf32>
    %346 = vector.multi_reduction <add>, %343, %cst_126 [1] : vector<8x32xf32> to vector<8xf32>
    %347 = vector.shape_cast %346 : vector<8xf32> to vector<8x1xf32>
    %cst_127 = arith.constant 3.200000e+01 : f32
    %348 = vector.broadcast %cst_127 : f32 to vector<8x1xf32>
    %349 = arith.divf %347, %348 : vector<8x1xf32>
    %350 = vector.broadcast %349 : vector<8x1xf32> to vector<8x32xf32>
    %351 = arith.subf %343, %350 : vector<8x32xf32>
    %352 = arith.mulf %351, %351 : vector<8x32xf32>
    %cst_128 = arith.constant dense<0.000000e+00> : vector<8xf32>
    %353 = vector.multi_reduction <add>, %352, %cst_128 [1] : vector<8x32xf32> to vector<8xf32>
    %354 = vector.shape_cast %353 : vector<8xf32> to vector<8x1xf32>
    %cst_129 = arith.constant 3.200000e+01 : f32
    %355 = vector.broadcast %cst_129 : f32 to vector<8x1xf32>
    %356 = arith.divf %354, %355 : vector<8x1xf32>
    %357 = vector.broadcast %349 : vector<8x1xf32> to vector<8x32xf32>
    %358 = arith.subf %343, %357 : vector<8x32xf32>
    %cst_130 = arith.constant 9.99999974E-6 : f32
    %359 = vector.broadcast %cst_130 : f32 to vector<8x1xf32>
    %360 = arith.addf %356, %359 : vector<8x1xf32>
    %361 = math.rsqrt %360 : vector<8x1xf32>
    %362 = vector.broadcast %361 : vector<8x1xf32> to vector<8x32xf32>
    %363 = arith.mulf %358, %362 : vector<8x32xf32>
    %364 = vector.broadcast %344 : vector<1x32xf32> to vector<8x32xf32>
    %365 = arith.mulf %363, %364 : vector<8x32xf32>
    %366 = vector.broadcast %345 : vector<1x32xf32> to vector<8x32xf32>
    %367 = arith.addf %365, %366 : vector<8x32xf32>
    %c0_131 = arith.constant 0 : index
    %c0_132 = arith.constant 0 : index
    %368 = vector.load %arg9[%c0_131, %c0_132] : memref<32x128xf32, #tpu.memory_space<vmem>>, vector<32x128xf32>
    %cst_133 = arith.constant dense<0.000000e+00> : vector<8x128xf32>
    %369 = tpu.matmul %367, %368, %cst_133 {dimension_numbers = #tpu.dot_dimension_numbers<[1], [0], [0], [1], [0, 0, 1, 1], [], []>} : vector<8x32xf32>, vector<32x128xf32>, vector<8x128xf32> -> vector<8x128xf32>
    %c0_134 = arith.constant 0 : index
    %c0_135 = arith.constant 0 : index
    %370 = vector.load %arg10[%c0_134, %c0_135] : memref<8x128xf32, #tpu.memory_space<vmem>>, vector<8x128xf32>
    tpu.vector_store %arg10[%c0_134, %c0_135], %369 {strides = array<i32>} : memref<8x128xf32, #tpu.memory_space<vmem>>, vector<8x128xf32>,
    return
  }
  func.func @transform_0(%arg0: i32) -> (i32, i32) {
    %c0_i32 = arith.constant 0 : i32
    %c0_i32_0 = arith.constant 0 : i32
    return %arg0, %c0_i32 : i32, i32
  }
  func.func @transform_1(%arg0: i32) -> (i32, i32) {
    %c0_i32 = arith.constant 0 : i32
    %c0_i32_0 = arith.constant 0 : i32
    %c0_i32_1 = arith.constant 0 : i32
    return %c0_i32, %c0_i32_0 : i32, i32
  }
  func.func @transform_2(%arg0: i32) -> (i32, i32) {
    %c0_i32 = arith.constant 0 : i32
    %c0_i32_0 = arith.constant 0 : i32
    %c0_i32_1 = arith.constant 0 : i32
    return %c0_i32, %c0_i32_0 : i32, i32
  }
  func.func @transform_3(%arg0: i32) -> (i32, i32, i32) {
    %c0_i32 = arith.constant 0 : i32
    %c0_i32_0 = arith.constant 0 : i32
    %c0_i32_1 = arith.constant 0 : i32
    %c0_i32_2 = arith.constant 0 : i32
    return %c0_i32, %c0_i32_0, %c0_i32_1 : i32, i32, i32
  }
  func.func @transform_4(%arg0: i32) -> (i32, i32, i32) {
    %c0_i32 = arith.constant 0 : i32
    %c0_i32_0 = arith.constant 0 : i32
    %c0_i32_1 = arith.constant 0 : i32
    %c0_i32_2 = arith.constant 0 : i32
    return %c0_i32, %c0_i32_0, %c0_i32_1 : i32, i32, i32
  }
  func.func @transform_5(%arg0: i32) -> (i32, i32, i32) {
    %c0_i32 = arith.constant 0 : i32
    %c0_i32_0 = arith.constant 0 : i32
    %c0_i32_1 = arith.constant 0 : i32
    %c0_i32_2 = arith.constant 0 : i32
    return %c0_i32, %c0_i32_0, %c0_i32_1 : i32, i32, i32
  }
  func.func @transform_6(%arg0: i32) -> (i32, i32, i32) {
    %c0_i32 = arith.constant 0 : i32
    %c0_i32_0 = arith.constant 0 : i32
    %c0_i32_1 = arith.constant 0 : i32
    %c0_i32_2 = arith.constant 0 : i32
    return %c0_i32, %c0_i32_0, %c0_i32_1 : i32, i32, i32
  }
  func.func @transform_7(%arg0: i32) -> (i32, i32) {
    %c0_i32 = arith.constant 0 : i32
    %c0_i32_0 = arith.constant 0 : i32
    %c0_i32_1 = arith.constant 0 : i32
    return %c0_i32, %c0_i32_0 : i32, i32
  }
  func.func @transform_8(%arg0: i32) -> (i32, i32) {
    %c0_i32 = arith.constant 0 : i32
    %c0_i32_0 = arith.constant 0 : i32
    %c0_i32_1 = arith.constant 0 : i32
    return %c0_i32, %c0_i32_0 : i32, i32
  }
  func.func @transform_9(%arg0: i32) -> (i32, i32) {
    %c0_i32 = arith.constant 0 : i32
    %c0_i32_0 = arith.constant 0 : i32
    return %arg0, %c0_i32 : i32, i32
  }
}

</mosaic_0001>

<bundles_post_ra>
// kernel: gpt_forward.1
= control target key start
LH: loop header
LB: loop body
LE: loop exit
PB: predicated region body
PF: predicated region fallthrough
CT: control target
= control target key end

     0   :  { %s3492_s30 = smov 0   ;;  %s4062_s0 = inlined_call_operand.vmem [shape: s32[16,1], index: 0, kind: input, shape index: {}]   ;;  %s4063_s1 = inlined_call_operand.vmem [shape: f32[128,32], index: 1, kind: input, shape index: {}]   ;;  %s4064_s2 = inlined_call_operand.vmem [shape: f32[8,32], index: 2, kind: input, shape index: {}]   ;;  %s4065_s3 = inlined_call_operand.vmem [shape: f32[2,32,128], index: 3, kind: input, shape index: {}]   ;;  %s4066_s4 = inlined_call_operand.vmem [shape: f32[2,32,32], index: 4, kind: input, shape index: {}]   ;;  %s4067_s5 = inlined_call_operand.vmem [shape: f32[2,32,128], index: 5, kind: input, shape index: {}]   ;;  %s4068_s6 = inlined_call_operand.vmem [shape: f32[2,128,32], index: 6, kind: input, shape index: {}]   ;;  %s4069_s7 = inlined_call_operand.vmem [shape: f32[18,128], index: 7, kind: input, shape index: {}]   ;;  %s4070_s8 = inlined_call_operand.vmem [shape: f32[32,128], index: 8, kind: input, shape index: {}]   ;;  %s4071_s9 = inlined_call_operand.vmem [shape: f32[16,128], index: 9, kind: output, shape index: {}]  }
   0x1 LB: > { %s2757_s10 = sadd.s32 4294967295, %s3420_s30   ;;  %p2761_p0 = scmp.ge.s32.totalorder %s3420_s30, 1  ;;  %s3420_s30 = sphi %s3492_s30, %s19_s30  }
   0x2   : > { %p286_p1 = scmp.lt.s32.totalorder %s3420_s30, 3 }
   0x4   : > { %p287_p2 = pnand %p2761_p0, %p286_p1 }
   0x5   : > { %p320_p3 = scmp.lt.s32.totalorder (!%p287_p2), %s2757_s10, 1  ;;  %v337_v0 = vld [vmem:[%s4063_s1] sm:$0xff] (!%p287_p2)  ;;  %v338_v1 = vld [vmem:[%s4063_s1 + $0x8] sm:$0xff] (!%p287_p2)  ;;  %v339_v2 = vld [vmem:[%s4063_s1 + $0x10] sm:$0xff] (!%p287_p2)  ;;  %v3422_v3 = vmov (!%p287_p2), 0   ;;  %v3423_v4 = vmov (!%p287_p2), 0.0|0.0   ;;  %v328_v28 = vlaneseq (!%p287_p2) }
   0x6   : > { %290 = sbr.rel (%p287_p2) target bundleno = 8534 (0x2156), region = 56  ;;  %3367 = vset.pattern.permute.xlu0 (!%p287_p2), %v3422_v3  ;;  %3225 = vmatprep.subr.bf16.mxu0 (!%p287_p2), %v3423_v4  ;;  %v3226_v5 = vpack.c.bf16 (!%p287_p2), %v338_v1, %v337_v0  ;;  %v340_v6 = vld [vmem:[%s4063_s1 + $0x18] sm:$0xff] (!%p287_p2)  ;;  %v341_v8 = vld [vmem:[%s4063_s1 + $0x20] sm:$0xff] (!%p287_p2)  ;;  %v342_v9 = vld [vmem:[%s4063_s1 + $0x28] sm:$0xff] (!%p287_p2)  ;;  %vm3424_vm0 = vmmov (!%p287_p2), 0   ;;  %v3425_v14 = vmov (!%p287_p2), 0.0  }
   0x7   : > { %3249 = vmatprep.subr.bf16.mxu1 (!%p287_p2), %v3423_v4  ;;  %v3229_v7 = vpack.c.bf16 (!%p287_p2), %v340_v6, %v339_v2  ;;  %v3232_v11 = vpack.c.bf16 (!%p287_p2), %v342_v9, %v341_v8  ;;  %v343_v12 = vld [vmem:[%s4063_s1 + $0x30] sm:$0xff] (!%p287_p2)  ;;  %v344_v13 = vld [vmem:[%s4063_s1 + $0x38] sm:$0xff] (!%p287_p2)  ;;  %2995 = vmatprep.mubr.msk.f32.mxu0 (!%p287_p2), %vm3424_vm0, %v3425_v14  ;;  %v345_v16 = vld [vmem:[%s4063_s1 + $0x40] sm:$0xff] (!%p287_p2)  ;;  %v329_v29 = vand.u32 (!%p287_p2), 127, %v328_v28  ;;  %v3426_v31 = vmov (!%p287_p2), 1.0   ;;  %s3427_s27 = smov (!%p287_p2), 64  }
   0x8   : > { %3227 = vmatpush3.bf16.msra.mxu0 (!%p287_p2), %v3226_v5  ;;  %3006 = vmatprep.mubr.msk.f32.mxu1 (!%p287_p2), %vm3424_vm0, %v3425_v14  ;;  %v3235_v15 = vpack.c.bf16 (!%p287_p2), %v344_v13, %v343_v12  ;;  %v346_v17 = vld [vmem:[%s4063_s1 + $0x48] sm:$0xff] (!%p287_p2)  ;;  %v347_v19 = vld [vmem:[%s4063_s1 + $0x50] sm:$0xff] (!%p287_p2)  ;;  %v348_v20 = vld [vmem:[%s4063_s1 + $0x58] sm:$0xff] (!%p287_p2)  ;;  %vm430_vm2 = vcmask (!%p287_p2), 261120   ;;  %s3428_s28 = smov (!%p287_p2), 96   ;;  %vm540_vm3 = vcmask (!%p287_p2), 64512  }
   0x9   : > { %3228 = vmatprep.subr.bf16.mxu0 (!%p287_p2), %v3423_v4  ;;  %v3238_v18 = vpack.c.bf16 (!%p287_p2), %v346_v17, %v345_v16  ;;  %v3241_v21 = vpack.c.bf16 (!%p287_p2), %v348_v20, %v347_v19  ;;  %v349_v22 = vld [vmem:[%s4063_s1 + $0x60] sm:$0xff] (!%p287_p2)  ;;  %v350_v23 = vld [vmem:[%s4063_s1 + $0x68] sm:$0xff] (!%p287_p2)  ;;  %v351_v25 = vld [vmem:[%s4063_s1 + $0x70] sm:$0xff] (!%p287_p2)  ;;  %v425_v63 = vshrl.u32 (!%p287_p2), %v328_v28, 7  ;;  %v3429_v0 = vmov (!%p287_p2), -1e+09  }
   0xa   : > { %v3244_v24 = vpack.c.bf16 (!%p287_p2), %v350_v23, %v349_v22  ;;  %v352_v26 = vld [vmem:[%s4063_s1 + $0x78] sm:$0xff] (!%p287_p2)  ;;  %v353_v32 = vld [vmem:[%s4064_s2] sm:$0xff] (!%p287_p2)  ;;  %v456_v43 = vld [vmem:[%s4065_s3 + $0x8] sm:$0xff] (!%p287_p2)  ;;  %s3430_s29 = smov (!%p287_p2), 88   ;;  %s3431_s11 = smov (!%p287_p2), 120   ;;  %vm1218_vm5 = vcmask (!%p287_p2), 130048  }
   0xb   : > { %v3247_v27 = vpack.c.bf16 (!%p287_p2), %v352_v26, %v351_v25  ;;  %v455_v42 = vld [vmem:[%s4065_s3] sm:$0xff] (!%p287_p2)  ;;  %v457_v44 = vld [vmem:[%s4065_s3 + $0x10] sm:$0xff] (!%p287_p2)  ;;  %v458_v46 = vld [vmem:[%s4065_s3 + $0x18] sm:$0xff] (!%p287_p2)  ;;  %vm426_vm4 = vcmp.le.s32.totalorder (!%p287_p2), %v329_v29, %v425_v63  ;;  %s3432_s12 = smov (!%p287_p2), 56   ;;  %s3433_s13 = smov (!%p287_p2), 112   ;;  %vm1220_vm6 = vcmask (!%p287_p2), 195584  }
   0xc   : > { %3230 = vmatpush3.bf16.msra.mxu0 (!%p287_p2), %v3229_v7  ;;  %v3250_v45 = vpack.c.bf16 (!%p287_p2), %v456_v43, %v455_v42  ;;  %v3253_v47 = vpack.c.bf16 (!%p287_p2), %v458_v46, %v457_v44  ;;  %v2766_v52 = vld [vmem:[%s4069_s7] ss:$0 sm:$0xff] (!%p287_p2)  ;;  %v2767_v54 = vld [vmem:[%s4069_s7 + $0x1] ss:$0 sm:$0xff] (!%p287_p2)  ;;  %v2768_v57 = vld [vmem:[%s4069_s7 + $0x2] ss:$0 sm:$0xff] (!%p287_p2) }
   0xd   : > { %s4083_s10 = smov (!%p320_p3, %s2757_s10), 1  ;;  %3231 = vmatprep.subr.bf16.mxu0 %v3423_v4  ;;  %v3620_v1 = vsel %vm426_vm4, 0.0, %v3429_v0  ;;  %s3434_s14 = smov 80  }
   0xe   : > { %s4072_s19 = sshll.u32 %s4083_s10, 3  ;;  %3251 = vmatpush3.bf16.msra.mxu1 %v3250_v45  ;;  %s4074_s15 = smov 48  }
   0xf   : > { %s323_s26 = scalar_lea.vmem %s4062_s0, %s4072_s19  ;;  %3252 = vmatprep.subr.bf16.mxu1 %v3423_v4  ;;  %s3436_s16 = smov 104  }
  0x10   : > { %v330_v10 = vld [vmem:[%s323_s26] sm:$0xff]  ;;  %3233 = vmatpush3.bf16.msra.mxu0 %v3232_v11  ;;  %s3437_s17 = smov 72   ;;  %s3438_s18 = smov 40  }
  0x11   : > { %332 = vperm.xlu0 %3367, %v330_v10   ;;  %3234 = vmatprep.subr.bf16.mxu0 %v3423_v4  ;;  %s4073_s20 = smov 16   ;;  %s4076_s21 = smov 8  }
  0x12   : > { %3254 = vmatpush3.bf16.msra.mxu1 %v3253_v47  ;;  %s4075_s22 = smov 24   ;;  %s4079_s24 = smov 16  }
  0x13   : > { %3009 = vmatprep.subr.mxu1 %v3425_v14 }
  0x14   : > { %3236 = vmatpush3.bf16.msra.mxu0 %v3235_v15 }
  0x15   : > { %3237 = vmatprep.subr.bf16.mxu0 %v3423_v4 }
  0x18   : > { %3239 = vmatpush3.bf16.msra.mxu0 %v3238_v18 }
  0x19   : > { %3240 = vmatprep.subr.bf16.mxu0 %v3423_v4 }
  0x1c   : > { %3242 = vmatpush3.bf16.msra.mxu0 %v3241_v21 }
  0x1d   : > { %3243 = vmatprep.subr.bf16.mxu0 %v3423_v4 }
  0x20   : > { %3245 = vmatpush3.bf16.msra.mxu0 %v3244_v24 }
  0x21   : > { %3246 = vmatprep.subr.bf16.mxu0 %v3423_v4 }
  0x24   : > { %3248 = vmatpush3.bf16.msra.mxu0 %v3247_v27 }
  0x25   : > { %3267 = vmatprep.subr.bf16.mxu0 %v3423_v4 }
  0x90   : > { %v333_v30 = vpop.permute.xlu0 %332 }
  0x91   : > { %vm334_vm1 = vcmp.eq.s32.totalorder %v329_v29, %v333_v30 }
  0x92   : > { %2996 = vmatmul.mubr.msk.f32.vlgmr.msra.gmra.mrb[0].mxu0 %vm334_vm1, %v3426_v31 }
  0x93   : > { %3103 = vmatprep.mubr.msk.f32.mxu0 %vm3424_vm0, %v3425_v14 }
 0x165   : > { %v420_v33 = vpop.f32.mrb[0].mxu0 }
 0x166   : > { %v3575_v34 = vadd.f32 %v420_v33, %v353_v32  ;;  %v2997_v35 = vpop.f32.mrb[1].mxu0 }
 0x168   : > { %v431_v36 = vsel %vm430_vm2, %v3575_v34, 0.0 }
 0x169   : > { %432 = vadd.xlane.f32.xlu0 %v431_v36 }
 0x1f6   : > { %v433_v37 = vpop.xlane.xlu0 %432 }
 0x1f7   : > { %v435_v38 = vmul.f32 0.03125, %v433_v37 }
 0x1f9   : > { %v436_v39 = vsub.f32 %v3575_v34, %v435_v38 }
 0x1fb   : > { %v437_v40 = vmul.f32 %v436_v39, %v436_v39 }
 0x1fd   : > { %v438_v41 = vsel %vm430_vm2, %v437_v40, 0.0 }
 0x1fe   : > { %439 = vadd.xlane.f32.xlu1 %v438_v41 }
 0x28b   : > { %v440_v48 = vpop.xlane.xlu1 %439 }
 0x28c   : > { %v441_v49 = vmul.f32 0.03125, %v440_v48 }
 0x28e   : > { %v442_v50 = vadd.f32 1e-05, %v441_v49 }
 0x290   : > { %3368 = vrsqrt.f32 %v442_v50 }
 0x29a   : > { %v3369_v51 = vpop.eup %3368 }
 0x29b   : > { %v444_v53 = vmul.f32 %v3369_v51, %v436_v39 }
 0x29d   : > { %v449_v55 = vmul.f32 %v2766_v52, %v444_v53 }
 0x29f   : > { %v454_v56 = vadd.f32 %v2767_v54, %v449_v55 }
 0x2a1   : > { %3007 = vmatmul.mubr.msk.f32.vlgmr.msra.gmra.mrb[0].mxu1 %vm430_vm2, %v454_v56 }
 0x2a2   : > { %3011 = vmatprep.mubr.msk.f32.mxu1 %vm3424_vm0, %v3425_v14 }
 0x374   : > { %v533_v58 = vpop.f32.mrb[0].mxu1 }
 0x375   : > { %v3607_v59 = vadd.f32 %v2768_v57, %v533_v58  ;;  %v3008_v60 = vpop.f32.mrb[1].mxu1 }
 0x377   : > { %628 = vrot.lane.b32.xlu0 %v3607_v59, %s3427_s27  ;;  %538 = vrot.lane.b32.xlu1 %v3607_v59, %s3428_s28 }
 0x3e9   : > { %v539_v61 = vpop.permute.xlu1 %538  ;;  %v629_v62 = vpop.permute.xlu0 %628 }
 0x3ea   : > { %3010 = vmatpush3.xpose.msk.msra.mxu1 %vm540_vm3, %v539_v61 }
 0x3eb   : > { %3014 = vmatprep.subr.mxu1 %v3425_v14 }
 0x3ed   : > { %3012 = vmatmul.mubr.msk.f32.vlgmr.msra.gmra.mrb[2].mxu1 %vm540_vm3, %v3607_v59 }
 0x3ee   : > { %3015 = vmatpush3.msra.mxu1 %v629_v62  ;;  %3016 = vmatprep.mubr.msk.f32.mxu1 %vm3424_vm0, %v3425_v14 }
 0x3ef   : > { %3019 = vmatprep.subr.mxu1 %v3425_v14 }
 0x4c0   : > { %v611_v2 = vpop.f32.mrb[2].mxu1 }
 0x4c1   : > { %v615_v3 = vmul.f32 0.35355338, %v611_v2  ;;  %v3013_v5 = vpop.f32.mrb[3].mxu1 }
 0x4c3   : > { %v616_v6 = vadd.f32 %v615_v3, %v3620_v1 }
 0x4c5   : > { %v617_v7 = vsel %vm540_vm3, %v616_v6, -inf }
 0x4c6   : > { %618 = vmax.xlane.f32.xlu1 %v617_v7 }
 0x4d7   : > { %706 = vrot.lane.b32.xlu1 %v3607_v59, %s3430_s29 }
 0x553   : > { %v619_v8 = vpop.xlane.xlu1 %618 }
 0x554   : > { %v620_v9 = vsub.f32 %v616_v6, %v619_v8 }
 0x556   : > { %v621_v10 = vmul.f32 1.442695, %v620_v9 }
 0x557   : > { %v707_v17 = vpop.permute.xlu1 %706 }
 0x558   : > { %3370 = vpow2.f32 %v621_v10  ;;  %v1222_v10 = vld [vmem:[%s4066_s4] sm:$0xff] }
 0x562   : > { %v3371_v11 = vpop.eup %3370 }
 0x563   : > { %v623_v12 = vsel %vm540_vm3, %v3371_v11, 0.0 }
 0x564   : > { %624 = vadd.xlane.f32.xlu0 %v623_v12  ;;  %v1224_v12 = vld [vmem:[%s4066_s4 + $0x10] sm:$0xff] }
 0x57a   : > { %704 = vrot.lane.b32.xlu0 %v3607_v59, %s3431_s11 }
 0x5f1   : > { %v625_v13 = vpop.xlane.xlu0 %624 }
 0x5f2   : > { %3372 = vrcp.f32 %v625_v13 }
 0x5f5   : > { %v705_v18 = vpop.permute.xlu0 %704 }
 0x5fc   : > { %v3373_v15 = vpop.eup %3372 }
 0x5fd   : > { %v627_v16 = vmul.f32 %v3373_v15, %v3371_v11  ;;  %v1223_v11 = vld [vmem:[%s4066_s4 + $0x8] sm:$0xff]  ;;  %v1225_v15 = vld [vmem:[%s4066_s4 + $0x18] sm:$0xff] }
 0x5fe   : > { %v3256_v13 = vpack.c.bf16 %v1223_v11, %v1222_v10  ;;  %v1436_v10 = vld [vmem:[%s4068_s6 + $0x70] sm:$0xff]  ;;  %v1437_v11 = vld [vmem:[%s4068_s6 + $0x78] sm:$0xff] }
 0x5ff   : > { %3017 = vmatmul.mubr.msk.f32.vlgmr.msra.gmra.mrb[4].mxu1 %vm540_vm3, %v627_v16  ;;  %v3259_v16 = vpack.c.bf16 %v1225_v15, %v1224_v12  ;;  %v3289_v12 = vpack.c.bf16 %v1437_v11, %v1436_v10 }
 0x600   : > { %3020 = vmatpush3.xpose.msk.msra.mxu1 %vm540_vm3, %v707_v17  ;;  %3021 = vmatprep.mubr.msk.f32.mxu1 %vm3424_vm0, %v3425_v14 }
 0x601   : > { %3024 = vmatprep.subr.mxu1 %v3425_v14 }
 0x603   : > { %3022 = vmatmul.mubr.msk.f32.vlgmr.msra.gmra.mrb[6].mxu1 %vm540_vm3, %v705_v18 }
 0x604   : > { %3026 = vmatprep.mubr.msk.f32.mxu1 %vm3424_vm0, %v3425_v14 }
 0x6d2   : > { %v3637_v19 = vpop.f32.mrb[4].mxu1 }
 0x6d3   : > { %v3018_v20 = vpop.f32.mrb[5].mxu1 }
 0x6d6   : > { %v778_v21 = vpop.f32.mrb[6].mxu1 }
 0x6d7   : > { %v782_v22 = vmul.f32 0.35355338, %v778_v21  ;;  %v3023_v23 = vpop.f32.mrb[7].mxu1 }
 0x6d9   : > { %v783_v24 = vadd.f32 %v782_v22, %v3620_v1 }
 0x6db   : > { %v784_v25 = vsel %vm540_vm3, %v783_v24, -inf }
 0x6dc   : > { %785 = vmax.xlane.f32.xlu0 %v784_v25 }
 0x6f2   : > { %795 = vrot.lane.b32.xlu0 %v3607_v59, %s3432_s12 }
 0x6f6   : > { %871 = vrot.lane.b32.xlu0 %v3607_v59, %s3433_s13 }
 0x769   : > { %v786_v26 = vpop.xlane.xlu0 %785 }
 0x76a   : > { %v787_v27 = vsub.f32 %v783_v24, %v786_v26 }
 0x76c   : > { %v788_v28 = vmul.f32 1.442695, %v787_v27  ;;  %v2783_v27 = vld [vmem:[%s4069_s7 + $0x3] ss:$0 sm:$0xff] }
 0x76d   : > { %v796_v29 = vpop.permute.xlu0 %795 }
 0x76e   : > { %3374 = vpow2.f32 %v788_v28  ;;  %3025 = vmatpush3.msra.mxu1 %v796_v29 }
 0x76f   : > { %3029 = vmatprep.subr.mxu1 %v3425_v14 }
 0x771   : > { %v872_v37 = vpop.permute.xlu0 %871 }
 0x778   : > { %v3375_v30 = vpop.eup %3374 }
 0x779   : > { %v790_v31 = vsel %vm540_vm3, %v3375_v30, 0.0 }
 0x77a   : > { %791 = vadd.xlane.f32.xlu1 %v790_v31 }
 0x78b   : > { %873 = vrot.lane.b32.xlu1 %v3607_v59, %s3434_s14 }
 0x807   : > { %v792_v32 = vpop.xlane.xlu1 %791 }
 0x808   : > { %3376 = vrcp.f32 %v792_v32 }
 0x80b   : > { %v874_v36 = vpop.permute.xlu1 %873 }
 0x812   : > { %v3377_v33 = vpop.eup %3376 }
 0x813   : > { %v794_v35 = vmul.f32 %v3377_v33, %v3375_v30 }
 0x815   : > { %3027 = vmatmul.mubr.msk.f32.vlgmr.msra.gmra.mrb[8].mxu1 %vm540_vm3, %v794_v35 }
 0x816   : > { %3030 = vmatpush3.xpose.msk.msra.mxu1 %vm540_vm3, %v874_v36  ;;  %3031 = vmatprep.mubr.msk.f32.mxu1 %vm3424_vm0, %v3425_v14 }
 0x817   : > { %3034 = vmatprep.subr.mxu1 %v3425_v14 }
 0x819   : > { %3032 = vmatmul.mubr.msk.f32.vlgmr.msra.gmra.mrb[10].mxu1 %vm540_vm3, %v872_v37  ;;  %v1331_v37 = vld [vmem:[%s4067_s5] sm:$0xff] }
 0x81a   : > { %3036 = vmatprep.mubr.msk.f32.mxu1 %vm3424_vm0, %v3425_v14 }
 0x8e8   : > { %v867_v38 = vpop.f32.mrb[8].mxu1 }
 0x8e9   : > { %v3028_v39 = vpop.f32.mrb[9].mxu1 }
 0x8ea   : > { %v1333_v39 = vld [vmem:[%s4067_s5 + $0x10] sm:$0xff] }
 0x8ec   : > { %v945_v40 = vpop.f32.mrb[10].mxu1 }
 0x8ed   : > { %v949_v41 = vmul.f32 0.35355338, %v945_v40  ;;  %v3033_v42 = vpop.f32.mrb[11].mxu1  ;;  %v1334_v40 = vld [vmem:[%s4067_s5 + $0x18] sm:$0xff] }
 0x8ee   : > { %v1422_v42 = vld [vmem:[%s4068_s6] sm:$0xff] }
 0x8ef   : > { %v950_v43 = vadd.f32 %v949_v41, %v3620_v1  ;;  %v3265_v41 = vpack.c.bf16 %v1334_v40, %v1333_v39  ;;  %v2791_v39 = vld [vmem:[%s4065_s3 + $0x20] sm:$0xff] }
 0x8f1   : > { %v951_v44 = vsel %vm540_vm3, %v950_v43, -inf }
 0x8f2   : > { %952 = vmax.xlane.f32.xlu0 %v951_v44 }
 0x908   : > { %962 = vrot.lane.b32.xlu0 %v3607_v59, %s4074_s15 }
 0x90c   : > { %1038 = vrot.lane.b32.xlu0 %v3607_v59, %s3436_s16 }
 0x97f   : > { %v953_v45 = vpop.xlane.xlu0 %952 }
 0x980   : > { %v954_v46 = vsub.f32 %v950_v43, %v953_v45  ;;  %v1423_v43 = vld [vmem:[%s4068_s6 + $0x8] sm:$0xff] }
 0x981   : > { %v3268_v44 = vpack.c.bf16 %v1423_v43, %v1422_v42  ;;  %v2794_v42 = vld [vmem:[%s4065_s3 + $0x38] sm:$0xff] }
 0x982   : > { %v955_v47 = vmul.f32 1.442695, %v954_v46 }
 0x983   : > { %v963_v48 = vpop.permute.xlu0 %962  ;;  %3269 = vmatpush3.bf16.msra.mxu0 %v3268_v44 }
 0x984   : > { %3378 = vpow2.f32 %v955_v47  ;;  %3035 = vmatpush3.msra.mxu1 %v963_v48  ;;  %3270 = vmatprep.subr.bf16.mxu0 %v3423_v4 }
 0x985   : > { %3039 = vmatprep.subr.mxu1 %v3425_v14 }
 0x987   : > { %v1039_v55 = vpop.permute.xlu0 %1038 }
 0x98e   : > { %v3379_v49 = vpop.eup %3378 }
 0x98f   : > { %v957_v50 = vsel %vm540_vm3, %v3379_v49, 0.0 }
 0x990   : > { %958 = vadd.xlane.f32.xlu1 %v957_v50 }
 0x9a1   : > { %1040 = vrot.lane.b32.xlu1 %v3607_v59, %s3437_s17 }
 0xa1d   : > { %v959_v51 = vpop.xlane.xlu1 %958 }
 0xa1e   : > { %3380 = vrcp.f32 %v959_v51  ;;  %v2785_v51 = vld [vmem:[%s4069_s7 + $0x5] ss:$0 sm:$0xff] }
 0xa21   : > { %v1041_v54 = vpop.permute.xlu1 %1040 }
 0xa28   : > { %v3381_v52 = vpop.eup %3380 }
 0xa29   : > { %v961_v53 = vmul.f32 %v3381_v52, %v3379_v49  ;;  %v2784_v49 = vld [vmem:[%s4069_s7 + $0x4] ss:$0 sm:$0xff] }
 0xa2b   : > { %3037 = vmatmul.mubr.msk.f32.vlgmr.msra.gmra.mrb[12].mxu1 %vm540_vm3, %v961_v53 }
 0xa2c   : > { %3040 = vmatpush3.xpose.msk.msra.mxu1 %vm540_vm3, %v1041_v54  ;;  %3041 = vmatprep.mubr.msk.f32.mxu1 %vm3424_vm0, %v3425_v14  ;;  %v1424_v54 = vld [vmem:[%s4068_s6 + $0x10] sm:$0xff] }
 0xa2d   : > { %3044 = vmatprep.subr.mxu1 %v3425_v14 }
 0xa2f   : > { %3042 = vmatmul.mubr.msk.f32.vlgmr.msra.gmra.mrb[14].mxu1 %vm540_vm3, %v1039_v55  ;;  %v1425_v55 = vld [vmem:[%s4068_s6 + $0x18] sm:$0xff] }
 0xa30   : > { %3046 = vmatprep.mubr.msk.f32.mxu1 %vm3424_vm0, %v3425_v14 }
 0xafe   : > { %v1034_v56 = vpop.f32.mrb[12].mxu1 }
 0xaff   : > { %v3038_v57 = vpop.f32.mrb[13].mxu1 }
 0xb00   : > { %v1426_v57 = vld [vmem:[%s4068_s6 + $0x20] sm:$0xff] }
 0xb02   : > { %v1112_v58 = vpop.f32.mrb[14].mxu1 }
 0xb03   : > { %v1116_v60 = vmul.f32 0.35355338, %v1112_v58  ;;  %v3043_v61 = vpop.f32.mrb[15].mxu1  ;;  %v1427_v58 = vld [vmem:[%s4068_s6 + $0x28] sm:$0xff] }
 0xb04   : > { %v1428_v61 = vld [vmem:[%s4068_s6 + $0x30] sm:$0xff] }
 0xb05   : > { %v1117_v62 = vadd.f32 %v1116_v60, %v3620_v1  ;;  %v3274_v60 = vpack.c.bf16 %v1427_v58, %v1426_v57 }
 0xb07   : > { %v1118_v63 = vsel %vm540_vm3, %v1117_v62, -inf }
 0xb08   : > { %1119 = vmax.xlane.f32.xlu0 %v1118_v63 }
 0xb1e   : > { %1129 = vrot.lane.b32.xlu0 %v3607_v59, %s3438_s18 }
 0xb22   : > { %1210 = vrot.lane.b32.xlu0 %v1034_v56, %s4073_s20  ;;  %v3271_v56 = vpack.c.bf16 %v1425_v55, %v1424_v54  ;;  %s4081_s20 = sshll.u32 %s4083_s10, 3 }
 0xb24   : > { %3272 = vmatpush3.bf16.msra.mxu0 %v3271_v56 }
 0xb25   : > { %3273 = vmatprep.subr.bf16.mxu0 %v3423_v4 }
 0xb28   : > { %3275 = vmatpush3.bf16.msra.mxu0 %v3274_v60 }
 0xb29   : > { %3276 = vmatprep.subr.bf16.mxu0 %v3423_v4 }
 0xb95   : > { %v1120_v0 = vpop.xlane.xlu0 %1119 }
 0xb96   : > { %v1121_v2 = vsub.f32 %v1117_v62, %v1120_v0  ;;  %v1429_v62 = vld [vmem:[%s4068_s6 + $0x38] sm:$0xff]  ;;  %v1430_v0 = vld [vmem:[%s4068_s6 + $0x40] sm:$0xff] }
 0xb97   : > { %v3277_v63 = vpack.c.bf16 %v1429_v62, %v1428_v61 }
 0xb98   : > { %v1122_v3 = vmul.f32 1.442695, %v1121_v2  ;;  %v1431_v2 = vld [vmem:[%s4068_s6 + $0x48] sm:$0xff] }
 0xb99   : > { %v1130_v5 = vpop.permute.xlu0 %1129  ;;  %3278 = vmatpush3.bf16.msra.mxu0 %v3277_v63 }
 0xb9a   : > { %3382 = vpow2.f32 %v1122_v3  ;;  %3045 = vmatpush3.msra.mxu1 %v1130_v5  ;;  %v3280_v3 = vpack.c.bf16 %v1431_v2, %v1430_v0  ;;  %3279 = vmatprep.subr.bf16.mxu0 %v3423_v4  ;;  %v1432_v5 = vld [vmem:[%s4068_s6 + $0x50] sm:$0xff] }
 0xb9b   : > { %3255 = vmatprep.subr.bf16.mxu1 %v3423_v4 }
 0xb9d   : > { %v1211_v22 = vpop.permute.xlu0 %1210  ;;  %3281 = vmatpush3.bf16.msra.mxu0 %v3280_v3 }
 0xb9e   : > { %3282 = vmatprep.subr.bf16.mxu0 %v3423_v4 }
 0xba4   : > { %v3383_v6 = vpop.eup %3382 }
 0xba5   : > { %v1124_v7 = vsel %vm540_vm3, %v3383_v6, 0.0 }
 0xba6   : > { %1125 = vadd.xlane.f32.xlu1 %v1124_v7 }
 0xbb7   : > { %1206 = vrot.lane.b32.xlu1 %v867_v38, %s4076_s21  ;;  %s4080_s21 = smov 24  }
 0xc33   : > { %v1126_v8 = vpop.xlane.xlu1 %1125 }
 0xc34   : > { %3384 = vrcp.f32 %v1126_v8  ;;  %v1434_v8 = vld [vmem:[%s4068_s6 + $0x60] sm:$0xff] }
 0xc37   : > { %v1207_v20 = vpop.permute.xlu1 %1206 }
 0xc38   : > { %v1217_v21 = vsel %vm540_vm3, %v3637_v19, %v1207_v20 }
 0xc39   : > { %v1219_v23 = vsel %vm1218_vm5, %v1217_v21, %v1211_v22 }
 0xc3e   : > { %v3385_v59 = vpop.eup %3384 }
 0xc3f   : > { %v1128_v9 = vmul.f32 %v3385_v59, %v3383_v6  ;;  %v1433_v6 = vld [vmem:[%s4068_s6 + $0x58] sm:$0xff]  ;;  %v1435_v59 = vld [vmem:[%s4068_s6 + $0x68] sm:$0xff] }
 0xc40   : > { %v3283_v7 = vpack.c.bf16 %v1433_v6, %v1432_v5 }
 0xc41   : > { %3047 = vmatmul.mubr.msk.f32.vlgmr.msra.gmra.mrb[16].mxu1 %vm540_vm3, %v1128_v9  ;;  %v3286_v9 = vpack.c.bf16 %v1435_v59, %v1434_v8 }
 0xc42   : > { %3057 = vmatprep.mubr.msk.f32.mxu1 %vm3424_vm0, %v3425_v14  ;;  %3257 = vmatpush3.bf16.msra.mxu1 %v3256_v13  ;;  %v2786_v13 = vld [vmem:[%s4069_s7 + $0x6] ss:$0 sm:$0xff] }
 0xc43   : > { %3258 = vmatprep.subr.bf16.mxu1 %v3423_v4  ;;  %3284 = vmatpush3.bf16.msra.mxu0 %v3283_v7 }
 0xc44   : > { %3285 = vmatprep.subr.bf16.mxu0 %v3423_v4 }
 0xc46   : > { %3260 = vmatpush3.bf16.msra.mxu1 %v3259_v16 }
 0xc47   : > { %3261 = vmatprep.subr.bf16.mxu1 %v3423_v4  ;;  %3287 = vmatpush3.bf16.msra.mxu0 %v3286_v9 }
 0xc48   : > { %3288 = vmatprep.subr.bf16.mxu0 %v3423_v4 }
 0xc4b   : > { %3290 = vmatpush3.bf16.msra.mxu0 %v3289_v12 }
 0xc4c   : > { %3147 = vmatprep.subr.mxu0 %v3425_v14 }
 0xd14   : > { %v1201_v17 = vpop.f32.mrb[16].mxu1 }
 0xd15   : > { %1214 = vrot.lane.b32.xlu1 %v1201_v17, %s4075_s22  ;;  %v3048_v18 = vpop.f32.mrb[17].mxu1 }
 0xd87   : > { %v1215_v24 = vpop.permute.xlu1 %1214 }
 0xd88   : > { %v1221_v25 = vsel %vm1220_vm6, %v1219_v23, %v1215_v24 }
 0xd89   : > { %3058 = vmatmul.mubr.msk.f32.vlgmr.msra.gmra.mrb[18].mxu1 %vm430_vm2, %v1221_v25 }
 0xd8a   : > { %3068 = vmatprep.mubr.msk.f32.mxu1 %vm3424_vm0, %v3425_v14 }
 0xe5c   : > { %v1295_v26 = vpop.f32.mrb[18].mxu1 }
 0xe5d   : > { %v1299_v19 = vadd.f32 %v1295_v26, %v3575_v34  ;;  %v3059_v28 = vpop.f32.mrb[19].mxu1  ;;  %v1332_v34 = vld [vmem:[%s4067_s5 + $0x8] sm:$0xff] }
 0xe5e   : > { %v3262_v38 = vpack.c.bf16 %v1332_v34, %v1331_v37  ;;  %v2788_v28 = vld [vmem:[%s4069_s7 + $0x7] ss:$0 sm:$0xff] }
 0xe5f   : > { %v3712_v29 = vadd.f32 %v2783_v27, %v1299_v19 }
 0xe60   : > { %3263 = vmatpush3.bf16.msra.mxu1 %v3262_v38 }
 0xe61   : > { %v1308_v30 = vsel %vm430_vm2, %v3712_v29, 0.0  ;;  %3264 = vmatprep.subr.bf16.mxu1 %v3423_v4 }
 0xe62   : > { %1309 = vadd.xlane.f32.xlu0 %v1308_v30 }
 0xe64   : > { %3266 = vmatpush3.bf16.msra.mxu1 %v3265_v41  ;;  %v2793_v41 = vld [vmem:[%s4065_s3 + $0x30] sm:$0xff] }
 0xe65   : > { %3291 = vmatprep.subr.bf16.mxu1 %v3423_v4  ;;  %v3295_v43 = vpack.c.bf16 %v2794_v42, %v2793_v41 }
 0xeef   : > { %v1310_v31 = vpop.xlane.xlu0 %1309 }
 0xef0   : > { %v1311_v32 = vmul.f32 0.03125, %v1310_v31 }
 0xef2   : > { %v1312_v33 = vsub.f32 %v3712_v29, %v1311_v32 }
 0xef4   : > { %v1313_v35 = vmul.f32 %v1312_v33, %v1312_v33 }
 0xef6   : > { %v1314_v36 = vsel %vm430_vm2, %v1313_v35, 0.0 }
 0xef7   : > { %1315 = vadd.xlane.f32.xlu1 %v1314_v36 }
 0xf84   : > { %v1316_v45 = vpop.xlane.xlu1 %1315 }
 0xf85   : > { %v1317_v46 = vmul.f32 0.03125, %v1316_v45 }
 0xf87   : > { %v1318_v47 = vadd.f32 1e-05, %v1317_v46 }
 0xf89   : > { %3386 = vrsqrt.f32 %v1318_v47 }
 0xf93   : > { %v3387_v48 = vpop.eup %3386 }
 0xf94   : > { %v1320_v50 = vmul.f32 %v3387_v48, %v1312_v33  ;;  %v2789_v48 = vld [vmem:[%s4069_s7 + $0x8] ss:$0 sm:$0xff] }
 0xf96   : > { %v1325_v52 = vmul.f32 %v2784_v49, %v1320_v50  ;;  %v2790_v50 = vld [vmem:[%s4069_s7 + $0x9] ss:$0 sm:$0xff] }
 0xf98   : > { %v1330_v53 = vadd.f32 %v2785_v51, %v1325_v52 }
 0xf9a   : > { %3069 = vmatmul.mubr.msk.f32.vlgmr.msra.gmra.mrb[20].mxu1 %vm430_vm2, %v1330_v53  ;;  %v2795_v53 = vld [vmem:[%s4069_s7 + $0xa] ss:$0 sm:$0xff] }
 0xf9b   : > { %3114 = vmatprep.mubr.msk.f32.mxu1 %vm3424_vm0, %v3425_v14 }
0x106d   : > { %v1409_v15 = vpop.f32.mrb[20].mxu1 }
0x106e   : > { %v1410_v16 = vadd.f32 %v2786_v13, %v1409_v15  ;;  %v3070_v17 = vpop.f32.mrb[21].mxu1 }
0x1070   : > { %v1414_v18 = vmul.f32 0.044715, %v1410_v16  ;;  %v1413_v25 = vmul.f32 0.5, %v1410_v16 }
0x1072   : > { %v1415_v20 = vmul.f32 %v1414_v18, %v1410_v16 }
0x1074   : > { %v1416_v21 = vmul.f32 %v1415_v20, %v1410_v16 }
0x1076   : > { %v1417_v22 = vadd.f32 %v1416_v21, %v1410_v16 }
0x1078   : > { %v1418_v23 = vmul.f32 0.7978846, %v1417_v22 }
0x107a   : > { %3388 = vtanh.f32 %v1418_v23 }
0x1084   : > { %v3389_v24 = vpop.eup %3388 }
0x1085   : > { %v1420_v26 = vadd.f32 1.0, %v3389_v24 }
0x1087   : > { %v1421_v27 = vmul.f32 %v1420_v26, %v1413_v25 }
0x1089   : > { %3104 = vmatmul.mubr.f32.vlgmr.msra.gmra.mrb[2].mxu0 %v1421_v27 }
0x108a   : > { %3149 = vmatprep.mubr.msk.f32.mxu0 %vm3424_vm0, %v3425_v14 }
0x115c   : > { %v1504_v19 = vpop.f32.mrb[2].mxu0 }
0x115d   : > { %v1508_v30 = vadd.f32 %v1504_v19, %v3712_v29  ;;  %v3105_v31 = vpop.f32.mrb[3].mxu0  ;;  %v2792_v29 = vld [vmem:[%s4065_s3 + $0x28] sm:$0xff] }
0x115e   : > { %v3292_v40 = vpack.c.bf16 %v2792_v29, %v2791_v39 }
0x115f   : > { %v3806_v32 = vadd.f32 %v2788_v28, %v1508_v30 }
0x1160   : > { %3293 = vmatpush3.bf16.msra.mxu1 %v3292_v40 }
0x1161   : > { %v1517_v33 = vsel %vm430_vm2, %v3806_v32, 0.0  ;;  %3294 = vmatprep.subr.bf16.mxu1 %v3423_v4 }
0x1162   : > { %1518 = vadd.xlane.f32.xlu0 %v1517_v33 }
0x1164   : > { %3296 = vmatpush3.bf16.msra.mxu1 %v3295_v43 }
0x1165   : > { %3117 = vmatprep.subr.mxu1 %v3425_v14 }
0x11ef   : > { %v1519_v35 = vpop.xlane.xlu0 %1518 }
0x11f0   : > { %v1520_v36 = vmul.f32 0.03125, %v1519_v35 }
0x11f2   : > { %v1521_v37 = vsub.f32 %v3806_v32, %v1520_v36 }
0x11f4   : > { %v1522_v34 = vmul.f32 %v1521_v37, %v1521_v37 }
0x11f6   : > { %v1523_v38 = vsel %vm430_vm2, %v1522_v34, 0.0 }
0x11f7   : > { %1524 = vadd.xlane.f32.xlu0 %v1523_v38 }
0x1284   : > { %v1525_v44 = vpop.xlane.xlu0 %1524 }
0x1285   : > { %v1526_v45 = vmul.f32 0.03125, %v1525_v44 }
0x1287   : > { %v1527_v46 = vadd.f32 1e-05, %v1526_v45 }
0x1289   : > { %3390 = vrsqrt.f32 %v1527_v46 }
0x1293   : > { %v3391_v47 = vpop.eup %3390 }
0x1294   : > { %v1529_v49 = vmul.f32 %v3391_v47, %v1521_v37 }
0x1296   : > { %v1534_v51 = vmul.f32 %v2789_v48, %v1529_v49 }
0x1298   : > { %v1539_v52 = vadd.f32 %v2790_v50, %v1534_v51 }
0x129a   : > { %3115 = vmatmul.mubr.msk.f32.vlgmr.msra.gmra.mrb[22].mxu1 %vm430_vm2, %v1539_v52 }
0x129b   : > { %3119 = vmatprep.mubr.msk.f32.mxu1 %vm3424_vm0, %v3425_v14 }
0x136d   : > { %v1619_v54 = vpop.f32.mrb[22].mxu1 }
0x136e   : > { %v3838_v55 = vadd.f32 %v2795_v53, %v1619_v54  ;;  %v3116_v56 = vpop.f32.mrb[23].mxu1 }
0x1370   : > { %1624 = vrot.lane.b32.xlu1 %v3838_v55, %s3428_s28  ;;  %s4078_s28 = smov 48  }
0x1374   : > { %1791 = vrot.lane.b32.xlu1 %v3838_v55, %s3430_s29 }
0x1378   : > { %1789 = vrot.lane.b32.xlu1 %v3838_v55, %s3431_s11 }
0x13e2   : > { %v1625_v57 = vpop.permute.xlu1 %1624 }
0x13e3   : > { %3118 = vmatpush3.xpose.msk.msra.mxu1 %vm540_vm3, %v1625_v57 }
0x13e4   : > { %3122 = vmatprep.subr.mxu1 %v3425_v14 }
0x13e6   : > { %3120 = vmatmul.mubr.msk.f32.vlgmr.msra.gmra.mrb[24].mxu1 %vm540_vm3, %v3838_v55  ;;  %v1792_v9 = vpop.permute.xlu1 %1791 }
0x13e7   : > { %3124 = vmatprep.mubr.msk.f32.mxu1 %vm3424_vm0, %v3425_v14 }
0x13ea   : > { %v1790_v11 = vpop.permute.xlu1 %1789 }
0x14b9   : > { %v1696_v58 = vpop.f32.mrb[24].mxu1 }
0x14ba   : > { %v1700_v60 = vmul.f32 0.35355338, %v1696_v58  ;;  %v3121_v61 = vpop.f32.mrb[25].mxu1 }
0x14bc   : > { %v1701_v62 = vadd.f32 %v1700_v60, %v3620_v1 }
0x14be   : > { %v1702_v63 = vsel %vm540_vm3, %v1701_v62, -inf }
0x14bf   : > { %1703 = vmax.xlane.f32.xlu0 %v1702_v63 }
0x154c   : > { %v1704_v0 = vpop.xlane.xlu0 %1703 }
0x154d   : > { %v1705_v2 = vsub.f32 %v1701_v62, %v1704_v0 }
0x154f   : > { %v1706_v3 = vmul.f32 1.442695, %v1705_v2  ;;  %v2810_v2 = vld [vmem:[%s4066_s4 + $0x28] sm:$0xff] }
0x1551   : > { %3392 = vpow2.f32 %v1706_v3 }
0x155b   : > { %v3393_v5 = vpop.eup %3392 }
0x155c   : > { %v1708_v6 = vsel %vm540_vm3, %v3393_v5, 0.0 }
0x155d   : > { %1709 = vadd.xlane.f32.xlu0 %v1708_v6  ;;  %v2812_v6 = vld [vmem:[%s4066_s4 + $0x38] sm:$0xff] }
0x1573   : > { %1713 = vrot.lane.b32.xlu0 %v3838_v55, %s3427_s27  ;;  %s4077_s27 = smov 8  }
0x15ea   : > { %v1710_v7 = vpop.xlane.xlu0 %1709 }
0x15eb   : > { %3394 = vrcp.f32 %v1710_v7 }
0x15ee   : > { %v1714_v8 = vpop.permute.xlu0 %1713 }
0x15ef   : > { %3123 = vmatpush3.msra.mxu1 %v1714_v8 }
0x15f0   : > { %3127 = vmatprep.subr.mxu1 %v3425_v14 }
0x15f5   : > { %v3395_v59 = vpop.eup %3394 }
0x15f6   : > { %v1712_v10 = vmul.f32 %v3395_v59, %v3393_v5  ;;  %v2811_v5 = vld [vmem:[%s4066_s4 + $0x30] sm:$0xff] }
0x15f7   : > { %v3301_v7 = vpack.c.bf16 %v2812_v6, %v2811_v5  ;;  %v2821_v5 = vld [vmem:[%s4069_s7 + $0xe] ss:$0 sm:$0xff] }
0x15f8   : > { %3125 = vmatmul.mubr.msk.f32.vlgmr.msra.gmra.mrb[26].mxu1 %vm540_vm3, %v1712_v10 }
0x15f9   : > { %3128 = vmatpush3.xpose.msk.msra.mxu1 %vm540_vm3, %v1792_v9  ;;  %3129 = vmatprep.mubr.msk.f32.mxu1 %vm3424_vm0, %v3425_v14 }
0x15fa   : > { %3132 = vmatprep.subr.mxu1 %v3425_v14 }
0x15fc   : > { %3130 = vmatmul.mubr.msk.f32.vlgmr.msra.gmra.mrb[28].mxu1 %vm540_vm3, %v1790_v11 }
0x15fd   : > { %3134 = vmatprep.mubr.msk.f32.mxu1 %vm3424_vm0, %v3425_v14 }
0x16cb   : > { %v3866_v12 = vpop.f32.mrb[26].mxu1 }
0x16cc   : > { %v3126_v13 = vpop.f32.mrb[27].mxu1 }
0x16cf   : > { %v1863_v15 = vpop.f32.mrb[28].mxu1 }
0x16d0   : > { %v1867_v16 = vmul.f32 0.35355338, %v1863_v15  ;;  %v3131_v17 = vpop.f32.mrb[29].mxu1 }
0x16d2   : > { %v1868_v18 = vadd.f32 %v1867_v16, %v3620_v1 }
0x16d4   : > { %v1869_v20 = vsel %vm540_vm3, %v1868_v18, -inf }
0x16d5   : > { %1870 = vmax.xlane.f32.xlu1 %v1869_v20 }
0x16e6   : > { %1880 = vrot.lane.b32.xlu1 %v3838_v55, %s3432_s12 }
0x16ea   : > { %1956 = vrot.lane.b32.xlu1 %v3838_v55, %s3433_s13 }
0x16ee   : > { %2125 = vrot.lane.b32.xlu1 %v3838_v55, %s3437_s17 }
0x1762   : > { %v1871_v21 = vpop.xlane.xlu1 %1870 }
0x1763   : > { %v1872_v22 = vsub.f32 %v1868_v18, %v1871_v21  ;;  %v2814_v21 = vld [vmem:[%s4069_s7 + $0xb] ss:$0 sm:$0xff] }
0x1765   : > { %v1873_v23 = vmul.f32 1.442695, %v1872_v22 }
0x1766   : > { %v1881_v24 = vpop.permute.xlu1 %1880 }
0x1767   : > { %3396 = vpow2.f32 %v1873_v23  ;;  %3133 = vmatpush3.msra.mxu1 %v1881_v24 }
0x1768   : > { %3137 = vmatprep.subr.mxu1 %v3425_v14 }
0x176a   : > { %v1957_v25 = vpop.permute.xlu1 %1956 }
0x176e   : > { %v2126_v26 = vpop.permute.xlu1 %2125 }
0x176f   : > { %3148 = vmatpush3.xpose.msk.msra.mxu0 %vm540_vm3, %v2126_v26 }
0x1770   : > { %3297 = vmatprep.subr.bf16.mxu0 %v3423_v4 }
0x1771   : > { %v3397_v27 = vpop.eup %3396 }
0x1772   : > { %v1875_v19 = vsel %vm540_vm3, %v3397_v27, 0.0 }
0x1773   : > { %1876 = vadd.xlane.f32.xlu0 %v1875_v19 }
0x1789   : > { %1958 = vrot.lane.b32.xlu0 %v3838_v55, %s3434_s14 }
0x178d   : > { %2123 = vrot.lane.b32.xlu0 %v3838_v55, %s3436_s16 }
0x1800   : > { %v1877_v28 = vpop.xlane.xlu0 %1876 }
0x1801   : > { %3398 = vrcp.f32 %v1877_v28 }
0x1804   : > { %v1959_v30 = vpop.permute.xlu0 %1958 }
0x1808   : > { %v2124_v31 = vpop.permute.xlu0 %2123 }
0x1809   : > { %3150 = vmatmul.mubr.msk.f32.vlgmr.msra.gmra.mrb[4].mxu0 %vm540_vm3, %v2124_v31 }
0x180a   : > { %3165 = vmatprep.mubr.msk.f32.mxu0 %vm3424_vm0, %v3425_v14 }
0x180b   : > { %v3399_v33 = vpop.eup %3398 }
0x180c   : > { %v1879_v35 = vmul.f32 %v3399_v33, %v3397_v27  ;;  %v2819_v33 = vld [vmem:[%s4067_s5 + $0x30] sm:$0xff] }
0x180e   : > { %3135 = vmatmul.mubr.msk.f32.vlgmr.msra.gmra.mrb[30].mxu1 %vm540_vm3, %v1879_v35  ;;  %v2820_v35 = vld [vmem:[%s4067_s5 + $0x38] sm:$0xff] }
0x180f   : > { %3138 = vmatpush3.xpose.msk.msra.mxu1 %vm540_vm3, %v1959_v30  ;;  %3139 = vmatprep.mubr.msk.f32.mxu1 %vm3424_vm0, %v3425_v14  ;;  %v2817_v30 = vld [vmem:[%s4067_s5 + $0x20] sm:$0xff] }
0x1810   : > { %3142 = vmatprep.subr.mxu1 %v3425_v14 }
0x1812   : > { %3140 = vmatmul.mubr.msk.f32.vlgmr.msra.gmra.mrb[32].mxu1 %vm540_vm3, %v1957_v25 }
0x1813   : > { %3144 = vmatprep.mubr.msk.f32.mxu1 %vm3424_vm0, %v3425_v14 }
0x18dc   : > { %v2197_v36 = vpop.f32.mrb[4].mxu0 }
0x18dd   : > { %v2201_v37 = vmul.f32 0.35355338, %v2197_v36  ;;  %v3151_v34 = vpop.f32.mrb[5].mxu0  ;;  %v3307_v36 = vpack.c.bf16 %v2820_v35, %v2819_v33  ;;  %v2628_v33 = vld [vmem:[%s4070_s8 + $0x10] sm:$0xff]  ;;  %v2629_v35 = vld [vmem:[%s4070_s8 + $0x18] sm:$0xff] }
0x18de   : > { %v2824_v34 = vld [vmem:[%s4068_s6 + $0x88] sm:$0xff] }
0x18df   : > { %v2202_v38 = vadd.f32 %v2201_v37, %v3620_v1  ;;  %v2823_v37 = vld [vmem:[%s4068_s6 + $0x80] sm:$0xff] }
0x18e1   : > { %v1952_v39 = vpop.f32.mrb[30].mxu1  ;;  %v2203_v29 = vsel %vm540_vm3, %v2202_v38, -inf }
0x18e2   : > { %v3136_v40 = vpop.f32.mrb[31].mxu1  ;;  %2204 = vmax.xlane.f32.xlu0 %v2203_v29 }
0x18e5   : > { %v2030_v41 = vpop.f32.mrb[32].mxu1 }
0x18e6   : > { %v2034_v42 = vmul.f32 0.35355338, %v2030_v41  ;;  %v3141_v43 = vpop.f32.mrb[33].mxu1 }
0x18e8   : > { %v2035_v44 = vadd.f32 %v2034_v42, %v3620_v1  ;;  %v2815_v42 = vld [vmem:[%s4069_s7 + $0xc] ss:$0 sm:$0xff] }
0x18ea   : > { %v2036_v45 = vsel %vm540_vm3, %v2035_v44, -inf }
0x18eb   : > { %2037 = vmax.xlane.f32.xlu1 %v2036_v45 }
0x196f   : > { %v2205_v46 = vpop.xlane.xlu0 %2204 }
0x1970   : > { %v2206_v47 = vsub.f32 %v2202_v38, %v2205_v46  ;;  %v3310_v38 = vpack.c.bf16 %v2824_v34, %v2823_v37 }
0x1972   : > { %v2207_v48 = vmul.f32 1.442695, %v2206_v47  ;;  %v2825_v47 = vld [vmem:[%s4068_s6 + $0x90] sm:$0xff] }
0x1974   : > { %3400 = vpow2.f32 %v2207_v48  ;;  %v2826_v48 = vld [vmem:[%s4068_s6 + $0x98] sm:$0xff] }
0x1978   : > { %v2038_v49 = vpop.xlane.xlu1 %2037 }
0x1979   : > { %v2039_v50 = vsub.f32 %v2035_v44, %v2038_v49  ;;  %v2816_v44 = vld [vmem:[%s4069_s7 + $0xd] ss:$0 sm:$0xff]  ;;  %v3313_v49 = vpack.c.bf16 %v2826_v48, %v2825_v47 }
0x197b   : > { %v2040_v51 = vmul.f32 1.442695, %v2039_v50  ;;  %v2827_v50 = vld [vmem:[%s4068_s6 + $0xa0] sm:$0xff] }
0x197d   : > { %3402 = vpow2.f32 %v2040_v51 }
0x197e   : > { %v3401_v52 = vpop.eup %3400 }
0x197f   : > { %v2209_v53 = vsel %vm540_vm3, %v3401_v52, 0.0 }
0x1980   : > { %2210 = vadd.xlane.f32.xlu1 %v2209_v53  ;;  %v2830_v53 = vld [vmem:[%s4068_s6 + $0xb8] sm:$0xff] }
0x1987   : > { %v3403_v54 = vpop.eup %3402 }
0x1988   : > { %v2042_v56 = vsel %vm540_vm3, %v3403_v54, 0.0 }
0x1989   : > { %2043 = vadd.xlane.f32.xlu0 %v2042_v56  ;;  %v2831_v56 = vld [vmem:[%s4068_s6 + $0xc0] sm:$0xff] }
0x1991   : > { %2214 = vrot.lane.b32.xlu1 %v3838_v55, %s3438_s18 }
0x1995   : > { %2291 = vrot.lane.b32.xlu1 %v1952_v39, %s4077_s27 }
0x199f   : > { %2047 = vrot.lane.b32.xlu0 %v3838_v55, %s4078_s28  ;;  %v2809_v55 = vld [vmem:[%s4066_s4 + $0x20] sm:$0xff]  ;;  %s327_s28 = scalar_lea.vmem %s4071_s9, %s4081_s20 }
0x19a0   : > { %v3298_v3 = vpack.c.bf16 %v2810_v2, %v2809_v55  ;;  %v2837_v55 = vld [vmem:[%s4068_s6 + $0xf0] sm:$0xff]  ;;  %v2838_v2 = vld [vmem:[%s4068_s6 + $0xf8] sm:$0xff] }
0x19a2   : > { %3299 = vmatpush3.bf16.msra.mxu0 %v3298_v3  ;;  %v3331_v3 = vpack.c.bf16 %v2838_v2, %v2837_v55 }
0x19a3   : > { %3300 = vmatprep.subr.bf16.mxu0 %v3423_v4 }
0x19a6   : > { %3302 = vmatpush3.bf16.msra.mxu0 %v3301_v7 }
0x19a7   : > { %3309 = vmatprep.subr.bf16.mxu0 %v3423_v4 }
0x1a0d   : > { %v2211_v1 = vpop.xlane.xlu1 %2210 }
0x1a11   : > { %v2215_v63 = vpop.permute.xlu1 %2214 }
0x1a15   : > { %v2292_v11 = vpop.permute.xlu1 %2291 }
0x1a16   : > { %v2044_v57 = vpop.xlane.xlu0 %2043  ;;  %v2302_v15 = vsel %vm540_vm3, %v3866_v12, %v2292_v11 }
0x1a17   : > { %3404 = vrcp.f32 %v2044_v57 }
0x1a18   : > { %3406 = vrcp.f32 %v2211_v1  ;;  %v2832_v1 = vld [vmem:[%s4068_s6 + $0xc8] sm:$0xff] }
0x1a19   : > { %v3322_v57 = vpack.c.bf16 %v2832_v1, %v2831_v56 }
0x1a1a   : > { %v2048_v58 = vpop.permute.xlu0 %2047 }
0x1a1b   : > { %3143 = vmatpush3.msra.mxu1 %v2048_v58  ;;  %v2833_v58 = vld [vmem:[%s4068_s6 + $0xd0] sm:$0xff] }
0x1a1c   : > { %3152 = vmatprep.subr.mxu1 %v3425_v14 }
0x1a21   : > { %v3405_v60 = vpop.eup %3404 }
0x1a22   : > { %v2046_v61 = vmul.f32 %v3405_v60, %v3403_v54  ;;  %v3407_v62 = vpop.eup %3406  ;;  %v2834_v60 = vld [vmem:[%s4068_s6 + $0xd8] sm:$0xff] }
0x1a23   : > { %v2213_v0 = vmul.f32 %v3407_v62, %v3401_v52  ;;  %v2829_v52 = vld [vmem:[%s4068_s6 + $0xb0] sm:$0xff]  ;;  %v2835_v62 = vld [vmem:[%s4068_s6 + $0xe0] sm:$0xff] }
0x1a24   : > { %3145 = vmatmul.mubr.msk.f32.vlgmr.msra.gmra.mrb[34].mxu1 %vm540_vm3, %v2046_v61  ;;  %v3319_v54 = vpack.c.bf16 %v2830_v53, %v2829_v52  ;;  %v3325_v61 = vpack.c.bf16 %v2834_v60, %v2833_v58 }
0x1a25   : > { %3153 = vmatpush3.msra.mxu1 %v2215_v63  ;;  %3154 = vmatprep.mubr.msk.f32.mxu1 %vm3424_vm0, %v3425_v14  ;;  %v2836_v63 = vld [vmem:[%s4068_s6 + $0xe8] sm:$0xff] }
0x1a26   : > { %3303 = vmatprep.subr.bf16.mxu1 %v3423_v4 }
0x1a28   : > { %3155 = vmatmul.mubr.msk.f32.vlgmr.msra.gmra.mrb[36].mxu1 %vm540_vm3, %v2213_v0  ;;  %v3328_v0 = vpack.c.bf16 %v2836_v63, %v2835_v62 }
0x1a29   : > { %3176 = vmatprep.mubr.msk.f32.mxu1 %vm3424_vm0, %v3425_v14 }
0x1af7   : > { %v2119_v8 = vpop.f32.mrb[34].mxu1 }
0x1af8   : > { %2295 = vrot.lane.b32.xlu0 %v2119_v8, %s4079_s24  ;;  %v3146_v59 = vpop.f32.mrb[35].mxu1 }
0x1afb   : > { %v2286_v9 = vpop.f32.mrb[36].mxu1 }
0x1afc   : > { %2299 = vrot.lane.b32.xlu1 %v2286_v9, %s4080_s21  ;;  %v3156_v10 = vpop.f32.mrb[37].mxu1 }
0x1b6a   : > { %v2296_v13 = vpop.permute.xlu0 %2295 }
0x1b6b   : > { %v2303_v16 = vsel %vm1218_vm5, %v2302_v15, %v2296_v13 }
0x1b6e   : > { %v2300_v17 = vpop.permute.xlu1 %2299 }
0x1b6f   : > { %v2304_v18 = vsel %vm1220_vm6, %v2303_v16, %v2300_v17 }
0x1b70   : > { %3166 = vmatmul.mubr.msk.f32.vlgmr.msra.gmra.mrb[6].mxu0 %vm430_vm2, %v2304_v18 }
0x1b71   : > { %3211 = vmatprep.mubr.msk.f32.mxu0 %vm3424_vm0, %v3425_v14  ;;  %3311 = vmatpush3.bf16.msra.mxu0 %v3310_v38 }
0x1b72   : > { %3312 = vmatprep.subr.bf16.mxu0 %v3423_v4 }
0x1b75   : > { %3314 = vmatpush3.bf16.msra.mxu0 %v3313_v49 }
0x1b76   : > { %3315 = vmatprep.subr.bf16.mxu0 %v3423_v4 }
0x1c43   : > { %v2379_v20 = vpop.f32.mrb[6].mxu0 }
0x1c44   : > { %v2383_v22 = vadd.f32 %v2379_v20, %v3806_v32  ;;  %v3167_v23 = vpop.f32.mrb[7].mxu0  ;;  %v2818_v32 = vld [vmem:[%s4067_s5 + $0x28] sm:$0xff] }
0x1c45   : > { %v3304_v31 = vpack.c.bf16 %v2818_v32, %v2817_v30  ;;  %v2626_v32 = vld [vmem:[%s4070_s8] sm:$0xff] }
0x1c46   : > { %v3941_v24 = vadd.f32 %v2814_v21, %v2383_v22  ;;  %v2839_v21 = vld [vmem:[%s4069_s7 + $0xf] ss:$0 sm:$0xff] }
0x1c47   : > { %3305 = vmatpush3.bf16.msra.mxu1 %v3304_v31 }
0x1c48   : > { %v2392_v12 = vsel %vm430_vm2, %v3941_v24, 0.0  ;;  %3306 = vmatprep.subr.bf16.mxu1 %v3423_v4 }
0x1c49   : > { %2393 = vadd.xlane.f32.xlu0 %v2392_v12 }
0x1c4b   : > { %3308 = vmatpush3.bf16.msra.mxu1 %v3307_v36  ;;  %v3337_v36 = vpack.c.bf16 %v2629_v35, %v2628_v33 }
0x1c4c   : > { %3333 = vmatprep.subr.bf16.mxu1 %v3423_v4 }
0x1cd6   : > { %v2394_v25 = vpop.xlane.xlu0 %2393 }
0x1cd7   : > { %v2395_v26 = vmul.f32 0.03125, %v2394_v25 }
0x1cd9   : > { %v2396_v27 = vsub.f32 %v3941_v24, %v2395_v26 }
0x1cdb   : > { %v2397_v19 = vmul.f32 %v2396_v27, %v2396_v27 }
0x1cdd   : > { %v2398_v28 = vsel %vm430_vm2, %v2397_v19, 0.0 }
0x1cde   : > { %2399 = vadd.xlane.f32.xlu1 %v2398_v28 }
0x1d6b   : > { %v2400_v39 = vpop.xlane.xlu1 %2399 }
0x1d6c   : > { %v2401_v29 = vmul.f32 0.03125, %v2400_v39 }
0x1d6e   : > { %v2402_v40 = vadd.f32 1e-05, %v2401_v29 }
0x1d70   : > { %3408 = vrsqrt.f32 %v2402_v40  ;;  %v2841_v40 = vld [vmem:[%s4069_s7 + $0x11] ss:$0 sm:$0xff] }
0x1d7a   : > { %v3409_v41 = vpop.eup %3408 }
0x1d7b   : > { %v2404_v43 = vmul.f32 %v3409_v41, %v2396_v27 }
0x1d7d   : > { %v2409_v45 = vmul.f32 %v2815_v42, %v2404_v43 }
0x1d7f   : > { %v2414_v46 = vadd.f32 %v2816_v44, %v2409_v45 }
0x1d81   : > { %3177 = vmatmul.mubr.msk.f32.vlgmr.msra.gmra.mrb[38].mxu1 %vm430_vm2, %v2414_v46 }
0x1d82   : > { %3222 = vmatprep.mubr.msk.f32.mxu1 %vm3424_vm0, %v3425_v14  ;;  %v2828_v14 = vld [vmem:[%s4068_s6 + $0xa8] sm:$0xff] }
0x1d83   : > { %v3316_v51 = vpack.c.bf16 %v2828_v14, %v2827_v50 }
0x1d85   : > { %3317 = vmatpush3.bf16.msra.mxu0 %v3316_v51 }
0x1d86   : > { %3318 = vmatprep.subr.bf16.mxu0 %v3423_v4 }
0x1d89   : > { %3320 = vmatpush3.bf16.msra.mxu0 %v3319_v54 }
0x1d8a   : > { %3321 = vmatprep.subr.bf16.mxu0 %v3423_v4 }
0x1d8d   : > { %3323 = vmatpush3.bf16.msra.mxu0 %v3322_v57 }
0x1d8e   : > { %3324 = vmatprep.subr.bf16.mxu0 %v3423_v4 }
0x1d91   : > { %3326 = vmatpush3.bf16.msra.mxu0 %v3325_v61 }
0x1d92   : > { %3327 = vmatprep.subr.bf16.mxu0 %v3423_v4 }
0x1d95   : > { %3329 = vmatpush3.bf16.msra.mxu0 %v3328_v0 }
0x1d96   : > { %3330 = vmatprep.subr.bf16.mxu0 %v3423_v4 }
0x1d99   : > { %3332 = vmatpush3.bf16.msra.mxu0 %v3331_v3 }
0x1e54   : > { %v2494_v6 = vpop.f32.mrb[38].mxu1 }
0x1e55   : > { %v2495_v7 = vadd.f32 %v2821_v5, %v2494_v6  ;;  %v3178_v8 = vpop.f32.mrb[39].mxu1 }
0x1e57   : > { %v2499_v59 = vmul.f32 0.044715, %v2495_v7  ;;  %v2498_v16 = vmul.f32 0.5, %v2495_v7 }
0x1e59   : > { %v2500_v9 = vmul.f32 %v2499_v59, %v2495_v7 }
0x1e5b   : > { %v2501_v10 = vmul.f32 %v2500_v9, %v2495_v7 }
0x1e5d   : > { %v2502_v11 = vadd.f32 %v2501_v10, %v2495_v7 }
0x1e5f   : > { %v2503_v13 = vmul.f32 0.7978846, %v2502_v11 }
0x1e61   : > { %3410 = vtanh.f32 %v2503_v13 }
0x1e6b   : > { %v3411_v15 = vpop.eup %3410 }
0x1e6c   : > { %v2505_v17 = vadd.f32 1.0, %v3411_v15 }
0x1e6e   : > { %v2506_v18 = vmul.f32 %v2505_v17, %v2498_v16 }
0x1e70   : > { %3212 = vmatmul.mubr.f32.vlgmr.msra.gmra.mrb[8].mxu0 %v2506_v18 }
0x1f43   : > { %v2590_v20 = vpop.f32.mrb[8].mxu0 }
0x1f44   : > { %v2594_v22 = vadd.f32 %v2590_v20, %v3941_v24  ;;  %v3213_v23 = vpop.f32.mrb[9].mxu0  ;;  %v2627_v24 = vld [vmem:[%s4070_s8 + $0x8] sm:$0xff] }
0x1f45   : > { %v3334_v31 = vpack.c.bf16 %v2627_v24, %v2626_v32 }
0x1f46   : > { %v2600_v12 = vadd.f32 %v2839_v21, %v2594_v22 }
0x1f47   : > { %3335 = vmatpush3.bf16.msra.mxu1 %v3334_v31 }
0x1f48   : > { %v2603_v25 = vsel %vm430_vm2, %v2600_v12, 0.0  ;;  %3336 = vmatprep.subr.bf16.mxu1 %v3423_v4  ;;  %v2840_v4 = vld [vmem:[%s4069_s7 + $0x10] ss:$0 sm:$0xff] }
0x1f49   : > { %2604 = vadd.xlane.f32.xlu0 %v2603_v25 }
0x1f4b   : > { %3338 = vmatpush3.bf16.msra.mxu1 %v3337_v36 }
0x1fd6   : > { %v2605_v26 = vpop.xlane.xlu0 %2604 }
0x1fd7   : > { %v2606_v27 = vmul.f32 0.03125, %v2605_v26 }
0x1fd9   : > { %v2607_v19 = vsub.f32 %v2600_v12, %v2606_v27 }
0x1fdb   : > { %v2608_v28 = vmul.f32 %v2607_v19, %v2607_v19 }
0x1fdd   : > { %v2609_v30 = vsel %vm430_vm2, %v2608_v28, 0.0 }
0x1fde   : > { %2610 = vadd.xlane.f32.xlu0 %v2609_v30 }
0x206b   : > { %v2611_v37 = vpop.xlane.xlu0 %2610 }
0x206c   : > { %v2612_v34 = vmul.f32 0.03125, %v2611_v37 }
0x206e   : > { %v2613_v38 = vadd.f32 1e-05, %v2612_v34 }
0x2070   : > { %3412 = vrsqrt.f32 %v2613_v38 }
0x207a   : > { %v3413_v39 = vpop.eup %3412 }
0x207b   : > { %v2615_v29 = vmul.f32 %v3413_v39, %v2607_v19 }
0x207d   : > { %v2620_v41 = vmul.f32 %v2840_v4, %v2615_v29 }
0x207f   : > { %v2625_v42 = vadd.f32 %v2841_v40, %v2620_v41 }
0x2081   : > { %3223 = vmatmul.mubr.msk.f32.vlgmr.msra.gmra.mrb[40].mxu1 %vm430_vm2, %v2625_v42 }
0x2154   : > { %v2699_v43 = vpop.f32.mrb[40].mxu1 }
0x2155   : > { %2703 = vst [vmem:[%s327_s28] sm:$0xff] %v2699_v43  ;;  %v3224_v44 = vpop.f32.mrb[41].mxu1 }
0x2156 PF: > { %s19_s30 = sadd.s32 1, %s3420_s30  }
0x2157   : > { %p16_p4 = scmp.ge.s32.totalorder %s19_s30, 4  }
0x2159   :  { %18 = sbr.rel (!%p16_p4) target bundleno = 1 (0x1), region = 90 }

</bundles_post_ra>
